<compile_context>
chip_gen: v5e
topology: v5e:2x2
jax: 0.10.0
libtpu: 0.0.40
codegen_flags: <defaults>
</compile_context>

<pallas_src>
import jax
import jax.numpy as jnp
from jax.experimental import pallas as pl
from jax.experimental.pallas import tpu as pltpu

# Layer dimensions from the PyTorch module.
DIMS = [784, 512, 256, 128, 64, 10]
D_IN_PAD = 896    # 784 -> 7*128 (lane-aligned K for layer 1)
D_OUT_PAD = 128   # 10  -> 128   (lane-dense output store)


def _round_up(x, m):
    return ((x + m - 1) // m) * m


def _epilogue_dtype():
    """bf16 bias+ReLU epilogue on chips with a packed bf16 VALU (v6e/v7x);
    f32 epilogue on older generations (v5e and earlier)."""
    try:
        kind = jax.devices()[0].device_kind.lower()
    except Exception:
        kind = ""
    if any(t in kind for t in ("v2", "v3", "v4", "v5")):
        return jnp.float32
    return jnp.bfloat16


def _pick_bm(batch, cap=1024):
    """Adaptive batch tile.

    * small batches: round_up(batch, 16) (16 = bf16 sublane pack) -> no
      redundant padded MXU work / DMA for small-batch inference.
    * large batches: up to `cap` rows per grid step (amortizes the ~0.35us
      fixed per-step cost).
    * whenever batch > 16, keep >= 2 grid steps so the parallel batch axis can
      shard across both v7x TensorCores.
    """
    bm = min(cap, _round_up(batch, 16))
    if 16 < batch <= bm:              # would be a single grid step -> split it
        bm = max(16, _round_up(pl.cdiv(batch, 2), 16))
    return bm


def mlp_kernel(x_ref,
               w1_ref, b1_ref,
               w2_ref, b2_ref,
               w3_ref, b3_ref,
               w4_ref, b4_ref,
               w5_ref, b5_ref,
               o_ref):
    """Fused 5-layer MLP for one (bm, 896) batch tile.

    All five matmuls run on the MXU with bf16 inputs and f32 accumulation.
    Bias-add / ReLU run on the VPU in the bias dtype (bf16 on v6e/v7x, f32 on
    v5e) and feed the next matmul in bf16. Weights/biases have constant block
    indices, so they are fetched from HBM once and stay VMEM-resident across
    grid steps.
    """
    def layer(h, w_ref, b_ref, relu):
        y = jnp.dot(h, w_ref[...], preferred_element_type=jnp.float32)
        y = y.astype(b_ref.dtype) + b_ref[...]
        if relu:
            y = jnp.maximum(y, 0).astype(jnp.bfloat16)   # bf16 feed for next MXU pass
        return y

    h = x_ref[...]                                   # (bm, 896) bf16
    h = layer(h, w1_ref, b1_ref, True)               # (bm, 512)
    h = layer(h, w2_ref, b2_ref, True)               # (bm, 256)
    h = layer(h, w3_ref, b3_ref, True)               # (bm, 128)
    h = layer(h, w4_ref, b4_ref, True)               # (bm, 64)
    o_ref[...] = layer(h, w5_ref, b5_ref, False).astype(o_ref.dtype)  # (bm, 128)


def net_forward(x, params, *, bm=None):
    """Forward pass matching PyTorch Net.forward.

    x: (B, 1, 28, 28) or anything reshapeable to (-1, 784).
    params: list of (W, b) with W shaped (in, out) f32, b shaped (1, out) f32.
    Returns (B, 10) float32 logits (bf16 matmul inputs, f32 accumulation).
    """
    epi_dtype = _epilogue_dtype()

    # x.view(-1, 784); cast to bf16 BEFORE padding so the batch pad and the
    # 784->896 lane pad below are a single pad over a bf16 array.
    x2 = x.reshape(-1, DIMS[0]).astype(jnp.bfloat16)
    B = x2.shape[0]

    if bm is None:
        bm = _pick_bm(B)
    B_pad = pl.cdiv(B, bm) * bm
    x2 = jnp.pad(x2, ((0, B_pad - B), (0, D_IN_PAD - DIMS[0])))

    # Weights -> bf16 (MXU inputs). W1 zero-padded on K (784 -> 896); the
    # 10-wide head zero-padded to 128 output lanes. Biases in the epilogue
    # dtype (added on the VPU after the f32 MXU accumulation).
    flat_params = []
    for li, (w, b) in enumerate(params):
        w = w.astype(jnp.float32)
        b = b.reshape(1, -1).astype(jnp.float32)
        if li == 0:
            w = jnp.pad(w, ((0, D_IN_PAD - DIMS[0]), (0, 0)))
        if li == len(params) - 1:
            w = jnp.pad(w, ((0, 0), (0, D_OUT_PAD - DIMS[-1])))
            b = jnp.pad(b, ((0, 0), (0, D_OUT_PAD - DIMS[-1])))
        flat_params += [w.astype(jnp.bfloat16), b.astype(epi_dtype)]

    # Full-array blocks with constant index_maps: fetched once, VMEM-resident.
    param_specs = [pl.BlockSpec(p.shape, lambda i: (0, 0)) for p in flat_params]

    # Advisory cost estimate (per whole call).
    layer_dims = list(zip([D_IN_PAD] + DIMS[1:-1], DIMS[1:-1] + [D_OUT_PAD]))
    flops = 2 * B_pad * sum(din * dout for din, dout in layer_dims)
    bytes_accessed = (int(x2.size) * 2 + B_pad * D_OUT_PAD * 2
                      + sum(int(p.size) * p.dtype.itemsize for p in flat_params))

    out = pl.pallas_call(
        mlp_kernel,
        # bf16 padded logits: lane-dense store, half the (mostly-padding)
        # output writeback; sliced to (B, 10) and upcast to f32 below.
        out_shape=jax.ShapeDtypeStruct((B_pad, D_OUT_PAD), jnp.bfloat16),
        grid_spec=pltpu.PrefetchScalarGridSpec(
            num_scalar_prefetch=0,
            grid=(B_pad // bm,),
            in_specs=[pl.BlockSpec((bm, D_IN_PAD), lambda i: (i, 0))] + param_specs,
            out_specs=pl.BlockSpec((bm, D_OUT_PAD), lambda i: (i, 0)),
        ),
        compiler_params=pltpu.CompilerParams(
            dimension_semantics=("parallel",),        # batch axis shards across TCs
            vmem_limit_bytes=32 * 1024 * 1024,        # headroom on v5e's 16 MiB default
        ),
        cost_estimate=pl.CostEstimate(
            flops=flops, transcendentals=0, bytes_accessed=bytes_accessed),
    )(x2, *flat_params)

    return out[:B, :DIMS[-1]].astype(jnp.float32)


def init_params(key):
    """Deterministic parameter init (PyTorch-Linear-style uniform bounds)."""
    params = []
    for fan_in, fan_out in zip(DIMS[:-1], DIMS[1:]):
        key, kw, kb = jax.random.split(key, 3)
        bound = 1.0 / jnp.sqrt(float(fan_in))
        w = jax.random.uniform(kw, (fan_in, fan_out), jnp.float32, -bound, bound)
        b = jax.random.uniform(kb, (1, fan_out), jnp.float32, -bound, bound)
        params.append((w, b))
    return params


def reference_matched(x, params, epi_dtype):
    """Plain-JAX reference mirroring the kernel's precision policy:
    bf16 MXU inputs, f32 accumulation, epilogue in epi_dtype, bf16 output."""
    h = x.reshape(-1, DIMS[0]).astype(jnp.bfloat16)
    y = None
    for i, (w, b) in enumerate(params):
        y = jnp.dot(h, w.astype(jnp.bfloat16), preferred_element_type=jnp.float32)
        y = y.astype(epi_dtype) + b.reshape(1, -1).astype(epi_dtype)
        if i < len(params) - 1:
            h = jnp.maximum(y, 0).astype(jnp.bfloat16)
    return y.astype(jnp.bfloat16).astype(jnp.float32)


def reference_f32(x, params):
    """Pure-f32 PyTorch semantics."""
    h = x.reshape(-1, DIMS[0]).astype(jnp.float32)
    for i, (w, b) in enumerate(params):
        h = h @ w + b.reshape(1, -1)
        if i < len(params) - 1:
            h = jnp.maximum(h, 0.0)
    return h


if __name__ == "__main__":
    key = jax.random.PRNGKey(0)
    key, kx = jax.random.split(key)

    # Small MNIST-like batch: NCHW (B=8, C=1, H=28, W=28). The adaptive tile
    # picks bm=16 here, so no 32x padded work for tiny inference batches.
    x = jax.random.normal(kx, (8, 1, 28, 28), dtype=jnp.float32)
    params = init_params(key)

    fwd = jax.jit(net_forward)
    out = jax.block_until_ready(fwd(x, params))
    assert out.shape == (8, 10), out.shape

    # Matched-precision oracle (bf16 MXU inputs, f32 accumulation, same
    # epilogue/output dtypes as the kernel).
    ref_m = reference_matched(x, params, _epilogue_dtype())
    assert jnp.allclose(out, ref_m, atol=2e-2, rtol=2e-2), \
        "mismatch vs matched-precision reference"

    # Pure-f32 PyTorch-semantics sanity check (loose tolerance: intentional
    # bf16 precision policy for MXU inputs).
    ref_f = reference_f32(x, params)
    assert jnp.allclose(out, ref_f, atol=1e-1, rtol=1e-1), \
        "mismatch vs f32 reference"

    print("KERNEL_OK")
</pallas_src>

<mosaic_0001>
module attributes {stable_mosaic.version = 11 : i64} {
  func.func @mlp_kernel(%arg0: i32, %arg1: memref<16x896xbf16, #tpu.memory_space<vmem>>, %arg2: memref<896x512xbf16, #tpu.memory_space<vmem>>, %arg3: memref<1x512xbf16, #tpu.memory_space<vmem>>, %arg4: memref<512x256xbf16, #tpu.memory_space<vmem>>, %arg5: memref<1x256xbf16, #tpu.memory_space<vmem>>, %arg6: memref<256x128xbf16, #tpu.memory_space<vmem>>, %arg7: memref<1x128xbf16, #tpu.memory_space<vmem>>, %arg8: memref<128x64xbf16, #tpu.memory_space<vmem>>, %arg9: memref<1x64xbf16, #tpu.memory_space<vmem>>, %arg10: memref<64x128xbf16, #tpu.memory_space<vmem>>, %arg11: memref<1x128xbf16, #tpu.memory_space<vmem>>, %arg12: memref<16x128xbf16, #tpu.memory_space<vmem>>) attributes {dimension_semantics = [#tpu.dimension_semantics<parallel>], iteration_bounds = array<i64: 1>, scalar_prefetch = 0 : i64, scratch_operands = 0 : i64, tpu.core_type = #tpu.core_type<tc>, window_params = [{transform_indices = @transform_0, window_bounds = array<i64: 16, 896>}, {pipeline_mode = #tpu.pipeline_mode<synchronous>, transform_indices = @transform_1, window_bounds = array<i64: 896, 512>}, {pipeline_mode = #tpu.pipeline_mode<synchronous>, transform_indices = @transform_2, window_bounds = array<i64: 1, 512>}, {pipeline_mode = #tpu.pipeline_mode<synchronous>, transform_indices = @transform_3, window_bounds = array<i64: 512, 256>}, {pipeline_mode = #tpu.pipeline_mode<synchronous>, transform_indices = @transform_4, window_bounds = array<i64: 1, 256>}, {pipeline_mode = #tpu.pipeline_mode<synchronous>, transform_indices = @transform_5, window_bounds = array<i64: 256, 128>}, {pipeline_mode = #tpu.pipeline_mode<synchronous>, transform_indices = @transform_6, window_bounds = array<i64: 1, 128>}, {pipeline_mode = #tpu.pipeline_mode<synchronous>, transform_indices = @transform_7, window_bounds = array<i64: 128, 64>}, {pipeline_mode = #tpu.pipeline_mode<synchronous>, transform_indices = @transform_8, window_bounds = array<i64: 1, 64>}, {pipeline_mode = #tpu.pipeline_mode<synchronous>, transform_indices = @transform_9, window_bounds = array<i64: 64, 128>}, {pipeline_mode = #tpu.pipeline_mode<synchronous>, transform_indices = @transform_10, window_bounds = array<i64: 1, 128>}, {transform_indices = @transform_11, window_bounds = array<i64: 16, 128>}]} {
    %c0 = arith.constant 0 : index
    %c0_0 = arith.constant 0 : index
    %0 = vector.load %arg1[%c0, %c0_0] : memref<16x896xbf16, #tpu.memory_space<vmem>>, vector<16x896xbf16>
    %c0_1 = arith.constant 0 : index
    %c0_2 = arith.constant 0 : index
    %1 = vector.load %arg2[%c0_1, %c0_2] : memref<896x512xbf16, #tpu.memory_space<vmem>>, vector<896x512xbf16>
    %cst = arith.constant dense<0.000000e+00> : vector<16x512xf32>
    %2 = tpu.matmul %0, %1, %cst {dimension_numbers = #tpu.dot_dimension_numbers<[1], [0], [0], [1], [0, 0, 1, 1], [], []>} : vector<16x896xbf16>, vector<896x512xbf16>, vector<16x512xf32> -> vector<16x512xf32>
    %3 = arith.truncf %2 : vector<16x512xf32> to vector<16x512xbf16>
    %c0_3 = arith.constant 0 : index
    %c0_4 = arith.constant 0 : index
    %4 = vector.load %arg3[%c0_3, %c0_4] : memref<1x512xbf16, #tpu.memory_space<vmem>>, vector<1x512xbf16>
    %5 = vector.broadcast %4 : vector<1x512xbf16> to vector<16x512xbf16>
    %6 = arith.addf %3, %5 : vector<16x512xbf16>
    %cst_5 = arith.constant 0.000000e+00 : bf16
    %7 = vector.broadcast %cst_5 : bf16 to vector<16x512xbf16>
    %8 = arith.maximumf %6, %7 : vector<16x512xbf16>
    %c0_6 = arith.constant 0 : index
    %c0_7 = arith.constant 0 : index
    %9 = vector.load %arg4[%c0_6, %c0_7] : memref<512x256xbf16, #tpu.memory_space<vmem>>, vector<512x256xbf16>
    %cst_8 = arith.constant dense<0.000000e+00> : vector<16x256xf32>
    %10 = tpu.matmul %8, %9, %cst_8 {dimension_numbers = #tpu.dot_dimension_numbers<[1], [0], [0], [1], [0, 0, 1, 1], [], []>} : vector<16x512xbf16>, vector<512x256xbf16>, vector<16x256xf32> -> vector<16x256xf32>
    %11 = arith.truncf %10 : vector<16x256xf32> to vector<16x256xbf16>
    %c0_9 = arith.constant 0 : index
    %c0_10 = arith.constant 0 : index
    %12 = vector.load %arg5[%c0_9, %c0_10] : memref<1x256xbf16, #tpu.memory_space<vmem>>, vector<1x256xbf16>
    %13 = vector.broadcast %12 : vector<1x256xbf16> to vector<16x256xbf16>
    %14 = arith.addf %11, %13 : vector<16x256xbf16>
    %cst_11 = arith.constant 0.000000e+00 : bf16
    %15 = vector.broadcast %cst_11 : bf16 to vector<16x256xbf16>
    %16 = arith.maximumf %14, %15 : vector<16x256xbf16>
    %c0_12 = arith.constant 0 : index
    %c0_13 = arith.constant 0 : index
    %17 = vector.load %arg6[%c0_12, %c0_13] : memref<256x128xbf16, #tpu.memory_space<vmem>>, vector<256x128xbf16>
    %cst_14 = arith.constant dense<0.000000e+00> : vector<16x128xf32>
    %18 = tpu.matmul %16, %17, %cst_14 {dimension_numbers = #tpu.dot_dimension_numbers<[1], [0], [0], [1], [0, 0, 1, 1], [], []>} : vector<16x256xbf16>, vector<256x128xbf16>, vector<16x128xf32> -> vector<16x128xf32>
    %19 = arith.truncf %18 : vector<16x128xf32> to vector<16x128xbf16>
    %c0_15 = arith.constant 0 : index
    %c0_16 = arith.constant 0 : index
    %20 = vector.load %arg7[%c0_15, %c0_16] : memref<1x128xbf16, #tpu.memory_space<vmem>>, vector<1x128xbf16>
    %21 = vector.broadcast %20 : vector<1x128xbf16> to vector<16x128xbf16>
    %22 = arith.addf %19, %21 : vector<16x128xbf16>
    %cst_17 = arith.constant 0.000000e+00 : bf16
    %23 = vector.broadcast %cst_17 : bf16 to vector<16x128xbf16>
    %24 = arith.maximumf %22, %23 : vector<16x128xbf16>
    %c0_18 = arith.constant 0 : index
    %c0_19 = arith.constant 0 : index
    %25 = vector.load %arg8[%c0_18, %c0_19] : memref<128x64xbf16, #tpu.memory_space<vmem>>, vector<128x64xbf16>
    %cst_20 = arith.constant dense<0.000000e+00> : vector<16x64xf32>
    %26 = tpu.matmul %24, %25, %cst_20 {dimension_numbers = #tpu.dot_dimension_numbers<[1], [0], [0], [1], [0, 0, 1, 1], [], []>} : vector<16x128xbf16>, vector<128x64xbf16>, vector<16x64xf32> -> vector<16x64xf32>
    %27 = arith.truncf %26 : vector<16x64xf32> to vector<16x64xbf16>
    %c0_21 = arith.constant 0 : index
    %c0_22 = arith.constant 0 : index
    %28 = vector.load %arg9[%c0_21, %c0_22] : memref<1x64xbf16, #tpu.memory_space<vmem>>, vector<1x64xbf16>
    %29 = vector.broadcast %28 : vector<1x64xbf16> to vector<16x64xbf16>
    %30 = arith.addf %27, %29 : vector<16x64xbf16>
    %cst_23 = arith.constant 0.000000e+00 : bf16
    %31 = vector.broadcast %cst_23 : bf16 to vector<16x64xbf16>
    %32 = arith.maximumf %30, %31 : vector<16x64xbf16>
    %c0_24 = arith.constant 0 : index
    %c0_25 = arith.constant 0 : index
    %33 = vector.load %arg10[%c0_24, %c0_25] : memref<64x128xbf16, #tpu.memory_space<vmem>>, vector<64x128xbf16>
    %cst_26 = arith.constant dense<0.000000e+00> : vector<16x128xf32>
    %34 = tpu.matmul %32, %33, %cst_26 {dimension_numbers = #tpu.dot_dimension_numbers<[1], [0], [0], [1], [0, 0, 1, 1], [], []>} : vector<16x64xbf16>, vector<64x128xbf16>, vector<16x128xf32> -> vector<16x128xf32>
    %35 = arith.truncf %34 : vector<16x128xf32> to vector<16x128xbf16>
    %c0_27 = arith.constant 0 : index
    %c0_28 = arith.constant 0 : index
    %36 = vector.load %arg11[%c0_27, %c0_28] : memref<1x128xbf16, #tpu.memory_space<vmem>>, vector<1x128xbf16>
    %37 = vector.broadcast %36 : vector<1x128xbf16> to vector<16x128xbf16>
    %38 = arith.addf %35, %37 : vector<16x128xbf16>
    %c0_29 = arith.constant 0 : index
    %c0_30 = arith.constant 0 : index
    %39 = vector.load %arg12[%c0_29, %c0_30] : memref<16x128xbf16, #tpu.memory_space<vmem>>, vector<16x128xbf16>
    tpu.vector_store %arg12[%c0_29, %c0_30], %38 {strides = array<i32>} : memref<16x128xbf16, #tpu.memory_space<vmem>>, vector<16x128xbf16>,
    return
  }
  func.func @transform_0(%arg0: i32) -> (i32, i32) {
    %c0_i32 = arith.constant 0 : i32
    %c0_i32_0 = arith.constant 0 : i32
    return %arg0, %c0_i32 : i32, i32
  }
  func.func @transform_1(%arg0: i32) -> (i32, i32) {
    %c0_i32 = arith.constant 0 : i32
    %c0_i32_0 = arith.constant 0 : i32
    %c0_i32_1 = arith.constant 0 : i32
    return %c0_i32, %c0_i32_0 : i32, i32
  }
  func.func @transform_2(%arg0: i32) -> (i32, i32) {
    %c0_i32 = arith.constant 0 : i32
    %c0_i32_0 = arith.constant 0 : i32
    %c0_i32_1 = arith.constant 0 : i32
    return %c0_i32, %c0_i32_0 : i32, i32
  }
  func.func @transform_3(%arg0: i32) -> (i32, i32) {
    %c0_i32 = arith.constant 0 : i32
    %c0_i32_0 = arith.constant 0 : i32
    %c0_i32_1 = arith.constant 0 : i32
    return %c0_i32, %c0_i32_0 : i32, i32
  }
  func.func @transform_4(%arg0: i32) -> (i32, i32) {
    %c0_i32 = arith.constant 0 : i32
    %c0_i32_0 = arith.constant 0 : i32
    %c0_i32_1 = arith.constant 0 : i32
    return %c0_i32, %c0_i32_0 : i32, i32
  }
  func.func @transform_5(%arg0: i32) -> (i32, i32) {
    %c0_i32 = arith.constant 0 : i32
    %c0_i32_0 = arith.constant 0 : i32
    %c0_i32_1 = arith.constant 0 : i32
    return %c0_i32, %c0_i32_0 : i32, i32
  }
  func.func @transform_6(%arg0: i32) -> (i32, i32) {
    %c0_i32 = arith.constant 0 : i32
    %c0_i32_0 = arith.constant 0 : i32
    %c0_i32_1 = arith.constant 0 : i32
    return %c0_i32, %c0_i32_0 : i32, i32
  }
  func.func @transform_7(%arg0: i32) -> (i32, i32) {
    %c0_i32 = arith.constant 0 : i32
    %c0_i32_0 = arith.constant 0 : i32
    %c0_i32_1 = arith.constant 0 : i32
    return %c0_i32, %c0_i32_0 : i32, i32
  }
  func.func @transform_8(%arg0: i32) -> (i32, i32) {
    %c0_i32 = arith.constant 0 : i32
    %c0_i32_0 = arith.constant 0 : i32
    %c0_i32_1 = arith.constant 0 : i32
    return %c0_i32, %c0_i32_0 : i32, i32
  }
  func.func @transform_9(%arg0: i32) -> (i32, i32) {
    %c0_i32 = arith.constant 0 : i32
    %c0_i32_0 = arith.constant 0 : i32
    %c0_i32_1 = arith.constant 0 : i32
    return %c0_i32, %c0_i32_0 : i32, i32
  }
  func.func @transform_10(%arg0: i32) -> (i32, i32) {
    %c0_i32 = arith.constant 0 : i32
    %c0_i32_0 = arith.constant 0 : i32
    %c0_i32_1 = arith.constant 0 : i32
    return %c0_i32, %c0_i32_0 : i32, i32
  }
  func.func @transform_11(%arg0: i32) -> (i32, i32) {
    %c0_i32 = arith.constant 0 : i32
    %c0_i32_0 = arith.constant 0 : i32
    return %arg0, %c0_i32 : i32, i32
  }
}

</mosaic_0001>

<bundles_post_ra>
// kernel: net_forward.1
= control target key start
LH: loop header
LB: loop body
LE: loop exit
PB: predicated region body
PF: predicated region fallthrough
CT: control target
= control target key end

     0   :  { %vm2721_vm0 = vcmask 523264   ;;  %s6446_s1 = inlined_call_operand.vmem [shape: bf16[896,512], index: 1, kind: input, shape index: {}]   ;;  %s6447_s0 = inlined_call_operand.vmem [shape: bf16[16,896], index: 0, kind: input, shape index: {}]   ;;  %s6448_s3 = inlined_call_operand.vmem [shape: bf16[512,256], index: 3, kind: input, shape index: {}]   ;;  %s6449_s2 = inlined_call_operand.vmem [shape: bf16[1,512], index: 2, kind: input, shape index: {}]   ;;  %s6450_s4 = inlined_call_operand.vmem [shape: bf16[1,256], index: 4, kind: input, shape index: {}]   ;;  %s6451_s5 = inlined_call_operand.vmem [shape: bf16[256,128], index: 5, kind: input, shape index: {}]   ;;  %s6452_s7 = inlined_call_operand.vmem [shape: bf16[128,64], index: 7, kind: input, shape index: {}]   ;;  %s6453_s6 = inlined_call_operand.vmem [shape: bf16[1,128], index: 6, kind: input, shape index: {}]   ;;  %s6454_s9 = inlined_call_operand.vmem [shape: bf16[64,128], index: 9, kind: input, shape index: {}]   ;;  %s6455_s8 = inlined_call_operand.vmem [shape: bf16[1,64], index: 8, kind: input, shape index: {}]   ;;  %s6456_s10 = inlined_call_operand.vmem [shape: bf16[1,128], index: 10, kind: input, shape index: {}]   ;;  %s6457_s11 = inlined_call_operand.vmem [shape: bf16[16,128], index: 11, kind: output, shape index: {}]  }
   0x1   :  { %v2901_v0 = vld [vmem:[%s6446_s1 + $0xe0] sm:$0xf]  ;;  %v4089_v1 = vld [vmem:[%s6446_s1 + $0xec] sm:$0xf0] }
   0x2   :  { %v3029_v2 = vld [vmem:[%s6446_s1 + $0x1e0] sm:$0xf]  ;;  %v2902_v3 = vor.u32 %v4089_v1, %v2901_v0  ;;  %v4121_v4 = vld [vmem:[%s6446_s1 + $0x1ec] sm:$0xf0] }
   0x3   :  { %v3157_v5 = vld [vmem:[%s6446_s1 + $0x2e0] sm:$0xf]  ;;  %v4153_v6 = vld [vmem:[%s6446_s1 + $0x2ec] sm:$0xf0]  ;;  %v3030_v7 = vor.u32 %v4121_v4, %v3029_v2 }
   0x4   :  { %v3158_v8 = vor.u32 %v4153_v6, %v3157_v5  ;;  %v3285_v9 = vld [vmem:[%s6446_s1 + $0x3e0] sm:$0xf]  ;;  %v4185_v10 = vld [vmem:[%s6446_s1 + $0x3ec] sm:$0xf0]  ;;  %1427 = vmatpush.bf16.msra.mxu0 %v2902_v3 }
   0x5   :  { %v2885_v11 = vld [vmem:[%s6446_s1 + $0xc0] sm:$0xf]  ;;  %v3286_v12 = vor.u32 %v4185_v10, %v3285_v9  ;;  %v4085_v13 = vld [vmem:[%s6446_s1 + $0xcc] sm:$0xf0]  ;;  %1441 = vmatpush.bf16.msra.mxu1 %v3030_v7 }
   0x6   :  { %v3013_v14 = vld [vmem:[%s6446_s1 + $0x1c0] sm:$0xf]  ;;  %v4117_v15 = vld [vmem:[%s6446_s1 + $0x1cc] sm:$0xf0]  ;;  %1455 = vmatpush.bf16.msra.mxu2 %v3158_v8  ;;  %v2886_v16 = vor.u32 %v4085_v13, %v2885_v11 }
   0x7   :  { %v3014_v17 = vor.u32 %v4117_v15, %v3013_v14  ;;  %v3141_v18 = vld [vmem:[%s6446_s1 + $0x2c0] sm:$0xf]  ;;  %v4149_v19 = vld [vmem:[%s6446_s1 + $0x2cc] sm:$0xf0]  ;;  %1469 = vmatpush.bf16.msra.mxu3 %v3286_v12 }
   0x8   :  { %v3269_v20 = vld [vmem:[%s6446_s1 + $0x3c0] sm:$0xf]  ;;  %v3142_v21 = vor.u32 %v4149_v19, %v3141_v18  ;;  %v4181_v22 = vld [vmem:[%s6446_s1 + $0x3cc] sm:$0xf0]  ;;  %1428 = vmatpush.bf16.msra.mxu0 %v2886_v16 }
   0x9   :  { %v2869_v23 = vld [vmem:[%s6446_s1 + $0xa0] sm:$0xf]  ;;  %v4081_v24 = vld [vmem:[%s6446_s1 + $0xac] sm:$0xf0]  ;;  %v3270_v25 = vor.u32 %v4181_v22, %v3269_v20  ;;  %1442 = vmatpush.bf16.msra.mxu1 %v3014_v17 }
   0xa   :  { %v2997_v26 = vld [vmem:[%s6446_s1 + $0x1a0] sm:$0xf]  ;;  %v4113_v27 = vld [vmem:[%s6446_s1 + $0x1ac] sm:$0xf0]  ;;  %v2870_v29 = vor.u32 %v4081_v24, %v2869_v23  ;;  %1456 = vmatpush.bf16.msra.mxu2 %v3142_v21 }
   0xb   :  { %v3125_v28 = vld [vmem:[%s6446_s1 + $0x2a0] sm:$0xf]  ;;  %v4145_v30 = vld [vmem:[%s6446_s1 + $0x2ac] sm:$0xf0]  ;;  %v2998_v33 = vor.u32 %v4113_v27, %v2997_v26  ;;  %1470 = vmatpush.bf16.msra.mxu3 %v3270_v25 }
   0xc   :  { %v3253_v31 = vld [vmem:[%s6446_s1 + $0x3a0] sm:$0xf]  ;;  %v4177_v32 = vld [vmem:[%s6446_s1 + $0x3ac] sm:$0xf0]  ;;  %v3126_v34 = vor.u32 %v4145_v30, %v3125_v28  ;;  %1429 = vmatpush.bf16.msra.mxu0 %v2870_v29 }
   0xd   :  { %v2853_v35 = vld [vmem:[%s6446_s1 + $0x80] sm:$0xf]  ;;  %v4077_v36 = vld [vmem:[%s6446_s1 + $0x8c] sm:$0xf0]  ;;  %v3254_v38 = vor.u32 %v4177_v32, %v3253_v31  ;;  %1443 = vmatpush.bf16.msra.mxu1 %v2998_v33 }
   0xe   :  { %v2981_v37 = vld [vmem:[%s6446_s1 + $0x180] sm:$0xf]  ;;  %v4109_v39 = vld [vmem:[%s6446_s1 + $0x18c] sm:$0xf0]  ;;  %v2854_v44 = vor.u32 %v4077_v36, %v2853_v35  ;;  %1457 = vmatpush.bf16.msra.mxu2 %v3126_v34 }
   0xf   :  { %v3109_v40 = vld [vmem:[%s6446_s1 + $0x280] sm:$0xf]  ;;  %v4141_v41 = vld [vmem:[%s6446_s1 + $0x28c] sm:$0xf0]  ;;  %v2982_v45 = vor.u32 %v4109_v39, %v2981_v37  ;;  %1471 = vmatpush.bf16.msra.mxu3 %v3254_v38  ;;  %v4087_v37 = vld [vmem:[%s6446_s1 + $0xe4] sm:$0xf] }
  0x10   :  { %v3237_v42 = vld [vmem:[%s6446_s1 + $0x380] sm:$0xf]  ;;  %v4173_v43 = vld [vmem:[%s6446_s1 + $0x38c] sm:$0xf0]  ;;  %v3110_v46 = vor.u32 %v4141_v41, %v3109_v40  ;;  %1430 = vmatpush.bf16.msra.mxu0 %v2854_v44  ;;  %v2903_v38 = vld [vmem:[%s6446_s1 + $0xf0] sm:$0xf0] }
  0x11   :  { %v2837_v47 = vld [vmem:[%s6446_s1 + $0x60] sm:$0xf]  ;;  %v4073_v48 = vld [vmem:[%s6446_s1 + $0x6c] sm:$0xf0]  ;;  %v3238_v50 = vor.u32 %v4173_v43, %v3237_v42  ;;  %1444 = vmatpush.bf16.msra.mxu1 %v2982_v45 }
  0x12   :  { %v2965_v49 = vld [vmem:[%s6446_s1 + $0x160] sm:$0xf]  ;;  %v4105_v51 = vld [vmem:[%s6446_s1 + $0x16c] sm:$0xf0]  ;;  %v2838_v56 = vor.u32 %v4073_v48, %v2837_v47  ;;  %1458 = vmatpush.bf16.msra.mxu2 %v3110_v46  ;;  %v2906_v48 = vor.u32 %v4087_v37, %v2903_v38 }
  0x13   :  { %v3093_v52 = vld [vmem:[%s6446_s1 + $0x260] sm:$0xf]  ;;  %v4137_v53 = vld [vmem:[%s6446_s1 + $0x26c] sm:$0xf0]  ;;  %v2966_v57 = vor.u32 %v4105_v51, %v2965_v49  ;;  %1472 = vmatpush.bf16.msra.mxu3 %v3238_v50  ;;  %v4083_v50 = vld [vmem:[%s6446_s1 + $0xc4] sm:$0xf] }
  0x14   :  { %v3221_v54 = vld [vmem:[%s6446_s1 + $0x360] sm:$0xf]  ;;  %v4169_v55 = vld [vmem:[%s6446_s1 + $0x36c] sm:$0xf0]  ;;  %v3094_v58 = vor.u32 %v4137_v53, %v3093_v52  ;;  %1431 = vmatpush.bf16.msra.mxu0 %v2838_v56  ;;  %v2887_v51 = vld [vmem:[%s6446_s1 + $0xd0] sm:$0xf0] }
  0x15   :  { %v2821_v59 = vld [vmem:[%s6446_s1 + $0x40] sm:$0xf]  ;;  %v4069_v60 = vld [vmem:[%s6446_s1 + $0x4c] sm:$0xf0]  ;;  %v3222_v62 = vor.u32 %v4169_v55, %v3221_v54  ;;  %1445 = vmatpush.bf16.msra.mxu1 %v2966_v57  ;;  %v4055_v53 = vld [vmem:[%s6447_s0 + $0x18] sm:$0xf0] }
  0x16   :  { %v2949_v61 = vld [vmem:[%s6446_s1 + $0x140] sm:$0xf]  ;;  %v4101_v63 = vld [vmem:[%s6446_s1 + $0x14c] sm:$0xf0]  ;;  %v2822_v4 = vor.u32 %v4069_v60, %v2821_v59  ;;  %1459 = vmatpush.bf16.msra.mxu2 %v3094_v58  ;;  %v2769_v54 = vld [vmem:[%s6447_s0 + $0x8] sm:$0xf] }
  0x17   :  { %v3077_v0 = vld [vmem:[%s6446_s1 + $0x240] sm:$0xf]  ;;  %v4133_v1 = vld [vmem:[%s6446_s1 + $0x24c] sm:$0xf0]  ;;  %v2950_v5 = vor.u32 %v4101_v63, %v2949_v61  ;;  %1473 = vmatpush.bf16.msra.mxu3 %v3222_v62  ;;  %v4056_v58 = vld [vmem:[%s6447_s0 + $0x20] sm:$0xf0] }
  0x18   :  { %v3205_v2 = vld [vmem:[%s6446_s1 + $0x340] sm:$0xf]  ;;  %v4165_v3 = vld [vmem:[%s6446_s1 + $0x34c] sm:$0xf0]  ;;  %v3078_v6 = vor.u32 %v4133_v1, %v3077_v0  ;;  %1432 = vmatpush.bf16.msra.mxu0 %v2822_v4  ;;  %v4706_v0 = vor.u32 %v4056_v58, %v2769_v54  ;;  %v2890_v1 = vor.u32 %v4083_v50, %v2887_v51  ;;  %v4079_v4 = vld [vmem:[%s6446_s1 + $0xa4] sm:$0xf] }
  0x19   :  { %v2805_v7 = vld [vmem:[%s6446_s1 + $0x20] sm:$0xf]  ;;  %v4065_v8 = vld [vmem:[%s6446_s1 + $0x2c] sm:$0xf0]  ;;  %v3206_v10 = vor.u32 %v4165_v3, %v3205_v2  ;;  %1446 = vmatpush.bf16.msra.mxu1 %v2950_v5  ;;  %v2871_v5 = vld [vmem:[%s6446_s1 + $0xb0] sm:$0xf0] }
  0x1a   :  { %v2933_v9 = vld [vmem:[%s6446_s1 + $0x120] sm:$0xf]  ;;  %v4097_v11 = vld [vmem:[%s6446_s1 + $0x12c] sm:$0xf0]  ;;  %v2806_v16 = vor.u32 %v4065_v8, %v2805_v7  ;;  %1460 = vmatpush.bf16.msra.mxu2 %v3078_v6  ;;  %v4052_v6 = vld [vmem:[%s6447_s0 + $0x4] sm:$0xf] }
  0x1b   :  { %v3061_v12 = vld [vmem:[%s6446_s1 + $0x220] sm:$0xf]  ;;  %v4129_v13 = vld [vmem:[%s6446_s1 + $0x22c] sm:$0xf0]  ;;  %v2934_v19 = vor.u32 %v4097_v11, %v2933_v9  ;;  %1474 = vmatpush.bf16.msra.mxu3 %v3206_v10 }
  0x1c   :  { %v3189_v14 = vld [vmem:[%s6446_s1 + $0x320] sm:$0xf]  ;;  %v4161_v15 = vld [vmem:[%s6446_s1 + $0x32c] sm:$0xf0]  ;;  %v3062_v20 = vor.u32 %v4129_v13, %v3061_v12  ;;  %1433 = vmatpush.bf16.msra.mxu0 %v2806_v16 }
  0x1d   :  { %v2789_v17 = vld [vmem:[%s6446_s1] sm:$0xf]  ;;  %v4061_v18 = vld [vmem:[%s6446_s1 + $0xc] sm:$0xf0]  ;;  %v3190_v24 = vor.u32 %v4161_v15, %v3189_v14  ;;  %1447 = vmatpush.bf16.msra.mxu1 %v2934_v19  ;;  %v4053_v19 = vld [vmem:[%s6447_s0 + $0xc] sm:$0xf] }
  0x1e   :  { %v2917_v21 = vld [vmem:[%s6446_s1 + $0x100] sm:$0xf]  ;;  %v4093_v22 = vld [vmem:[%s6446_s1 + $0x10c] sm:$0xf0]  ;;  %v2790_v31 = vor.u32 %v4061_v18, %v2789_v17  ;;  %1461 = vmatpush.bf16.msra.mxu2 %v3062_v20  ;;  %v2874_v17 = vor.u32 %v4079_v4, %v2871_v5  ;;  %v2771_v20 = vld [vmem:[%s6447_s0 + $0x24] sm:$0xf0] }
  0x1f   :  { %v3045_v23 = vld [vmem:[%s6446_s1 + $0x200] sm:$0xf]  ;;  %v4125_v25 = vld [vmem:[%s6446_s1 + $0x20c] sm:$0xf0]  ;;  %v2918_v35 = vor.u32 %v4093_v22, %v2917_v21  ;;  %1475 = vmatpush.bf16.msra.mxu3 %v3190_v24  ;;  %v4075_v21 = vld [vmem:[%s6446_s1 + $0x84] sm:$0xf] }
  0x20   :  { %v3173_v26 = vld [vmem:[%s6446_s1 + $0x300] sm:$0xf]  ;;  %v4157_v27 = vld [vmem:[%s6446_s1 + $0x30c] sm:$0xf0]  ;;  %v3046_v36 = vor.u32 %v4125_v25, %v3045_v23  ;;  %1434 = vmatpush.bf16.msra.mxu0 %v2790_v31  ;;  %v2855_v22 = vld [vmem:[%s6446_s1 + $0x90] sm:$0xf0]  ;;  %v4761_v23 = vor.u32 %v4053_v19, %v2771_v20 }
  0x21   :  { %v3413_v28 = vld [vmem:[%s6446_s1 + $0x4e0] sm:$0xf]  ;;  %v4217_v29 = vld [vmem:[%s6446_s1 + $0x4ec] sm:$0xf0]  ;;  %v3174_v39 = vor.u32 %v4157_v27, %v3173_v26  ;;  %1448 = vmatpush.bf16.msra.mxu1 %v2918_v35  ;;  %v2839_v35 = vld [vmem:[%s6446_s1 + $0x70] sm:$0xf0] }
  0x22   :  { %v3541_v30 = vld [vmem:[%s6446_s1 + $0x5e0] sm:$0xf]  ;;  %v4249_v32 = vld [vmem:[%s6446_s1 + $0x5ec] sm:$0xf0]  ;;  %v3414_v40 = vor.u32 %v4217_v29, %v3413_v28  ;;  %1462 = vmatpush.bf16.msra.mxu2 %v3046_v36  ;;  %v3415_v19 = vld [vmem:[%s6446_s1 + $0x4f0] sm:$0xf0] }
  0x23   :  { %v3669_v33 = vld [vmem:[%s6446_s1 + $0x6e0] sm:$0xf]  ;;  %v4281_v34 = vld [vmem:[%s6446_s1 + $0x6ec] sm:$0xf0]  ;;  %v3542_v43 = vor.u32 %v4249_v32, %v3541_v30  ;;  %1476 = vmatpush.bf16.msra.mxu3 %v3174_v39  ;;  %v2858_v30 = vor.u32 %v4075_v21, %v2855_v22 }
  0x24   :  { %v3397_v41 = vld [vmem:[%s6446_s1 + $0x4c0] sm:$0xf]  ;;  %v4213_v42 = vld [vmem:[%s6446_s1 + $0x4cc] sm:$0xf0]  ;;  %v3670_v44 = vor.u32 %v4281_v34, %v3669_v33  ;;  %1483 = vmatpush.bf16.msrb.mxu0 %v3414_v40  ;;  %v4071_v34 = vld [vmem:[%s6446_s1 + $0x64] sm:$0xf] }
  0x25   :  { %v3525_v45 = vld [vmem:[%s6446_s1 + $0x5c0] sm:$0xf]  ;;  %v4245_v46 = vld [vmem:[%s6446_s1 + $0x5cc] sm:$0xf0]  ;;  %v3398_v55 = vor.u32 %v4213_v42, %v3397_v41  ;;  %1497 = vmatpush.bf16.msrb.mxu1 %v3542_v43  ;;  %1463 = vmatmul.bf16.vlgmr.msra.gmra.mxu2 %v4706_v0  ;;  %v2842_v42 = vor.u32 %v4071_v34, %v2839_v35  ;;  %v3015_v34 = vld [vmem:[%s6446_s1 + $0x1d0] sm:$0xf0] }
  0x26   :  { %v3653_v47 = vld [vmem:[%s6446_s1 + $0x6c0] sm:$0xf]  ;;  %v4277_v49 = vld [vmem:[%s6446_s1 + $0x6cc] sm:$0xf0]  ;;  %1511 = vmatpush.bf16.msrb.mxu2 %v3670_v44  ;;  %v3526_v59 = vor.u32 %v4245_v46, %v3525_v45  ;;  %1477 = vmatmul.bf16.vlgmr.msra.gmra.mxu3 %v4761_v23  ;;  %v4067_v46 = vld [vmem:[%s6446_s1 + $0x44] sm:$0xf] }
  0x27   :  { %v2761_v52 = vld [vmem:[%s6447_s0] sm:$0xf]  ;;  %v3654_v60 = vor.u32 %v4277_v49, %v3653_v47  ;;  %v4209_v61 = vld [vmem:[%s6446_s1 + $0x4ac] sm:$0xf0]  ;;  %1525 = vmatpush.bf16.msrb.mxu3 %v2906_v48  ;;  %v2823_v47 = vld [vmem:[%s6446_s1 + $0x50] sm:$0xf0] }
  0x28   :  { %v3381_v56 = vld [vmem:[%s6446_s1 + $0x4a0] sm:$0xf]  ;;  %v4692_v57 = vor.u32 %v4055_v53, %v2761_v52  ;;  %v4241_v63 = vld [vmem:[%s6446_s1 + $0x5ac] sm:$0xf0]  ;;  %1484 = vmatpush.bf16.msrb.mxu0 %v3398_v55  ;;  %v2826_v54 = vor.u32 %v4067_v46, %v2823_v47  ;;  %v4147_v35 = vld [vmem:[%s6446_s1 + $0x2c4] sm:$0xf] }
  0x29   :  { %v3509_v62 = vld [vmem:[%s6446_s1 + $0x5a0] sm:$0xf]  ;;  %v4273_v3 = vld [vmem:[%s6446_s1 + $0x6ac] sm:$0xf0]  ;;  %v3382_v8 = vor.u32 %v4209_v61, %v3381_v56  ;;  %1498 = vmatpush.bf16.msrb.mxu1 %v3526_v59  ;;  %v4063_v59 = vld [vmem:[%s6446_s1 + $0x24] sm:$0xf] }
  0x2a   :  { %v3637_v2 = vld [vmem:[%s6446_s1 + $0x6a0] sm:$0xf]  ;;  %1435 = vmatmul.bf16.vlgmr.msra.gmra.mxu0 %v4692_v57  ;;  %v4205_v10 = vld [vmem:[%s6446_s1 + $0x48c] sm:$0xf0]  ;;  %1512 = vmatpush.bf16.msrb.mxu2 %v3654_v60  ;;  %v3510_v12 = vor.u32 %v4241_v63, %v3509_v62  ;;  %v2807_v60 = vld [vmem:[%s6446_s1 + $0x30] sm:$0xf0] }
  0x2b   :  { %v2763_v7 = vld [vmem:[%s6447_s0 + $0x1c] sm:$0xf0]  ;;  %v3638_v13 = vor.u32 %v4273_v3, %v3637_v2  ;;  %v4237_v15 = vld [vmem:[%s6446_s1 + $0x58c] sm:$0xf0]  ;;  %1526 = vmatpush.bf16.msrb.mxu3 %v2890_v1 }
  0x2c   :  { %v3365_v9 = vld [vmem:[%s6446_s1 + $0x480] sm:$0xf]  ;;  %v4734_v11 = vor.u32 %v4052_v6, %v2763_v7  ;;  %v4269_v18 = vld [vmem:[%s6446_s1 + $0x68c] sm:$0xf0]  ;;  %1485 = vmatpush.bf16.msrb.mxu0 %v3382_v8  ;;  %v4059_v7 = vld [vmem:[%s6446_s1 + $0x4] sm:$0xf]  ;;  %v2810_v8 = vor.u32 %v4063_v59, %v2807_v60 }
  0x2d   :  { %v3493_v14 = vld [vmem:[%s6446_s1 + $0x580] sm:$0xf]  ;;  %v3366_v24 = vor.u32 %v4205_v10, %v3365_v9  ;;  %1499 = vmatpush.bf16.msrb.mxu1 %v3510_v12  ;;  %v4201_v28 = vld [vmem:[%s6446_s1 + $0x46c] sm:$0xf0]  ;;  %v2791_v9 = vld [vmem:[%s6446_s1 + $0x10] sm:$0xf0] }
  0x2e   :  { %v3621_v16 = vld [vmem:[%s6446_s1 + $0x680] sm:$0xf]  ;;  %1449 = vmatmul.bf16.vlgmr.msra.gmra.mxu1 %v4734_v11  ;;  %1513 = vmatpush.bf16.msrb.mxu2 %v3638_v13  ;;  %v3494_v25 = vor.u32 %v4237_v15, %v3493_v14  ;;  %v4233_v31 = vld [vmem:[%s6446_s1 + $0x56c] sm:$0xf0]  ;;  %v4119_v10 = vld [vmem:[%s6446_s1 + $0x1e4] sm:$0xf] }
  0x2f   :  { %v3622_v26 = vor.u32 %v4269_v18, %v3621_v16  ;;  %v3349_v27 = vld [vmem:[%s6446_s1 + $0x460] sm:$0xf]  ;;  %1527 = vmatpush.bf16.msrb.mxu3 %v2874_v17  ;;  %v4265_v33 = vld [vmem:[%s6446_s1 + $0x66c] sm:$0xf0]  ;;  %v3031_v12 = vld [vmem:[%s6446_s1 + $0x1f0] sm:$0xf0] }
  0x30   :  { %v3477_v29 = vld [vmem:[%s6446_s1 + $0x560] sm:$0xf]  ;;  %1486 = vmatpush.bf16.msrb.mxu0 %v3366_v24  ;;  %v3350_v36 = vor.u32 %v4201_v28, %v3349_v27  ;;  %v4197_v40 = vld [vmem:[%s6446_s1 + $0x44c] sm:$0xf0]  ;;  %v4151_v13 = vld [vmem:[%s6446_s1 + $0x2e4] sm:$0xf]  ;;  %v3034_v27 = vor.u32 %v4119_v10, %v3031_v12 }
  0x31   :  { %v3605_v32 = vld [vmem:[%s6446_s1 + $0x660] sm:$0xf]  ;;  %1500 = vmatpush.bf16.msrb.mxu1 %v3494_v25  ;;  %v3478_v37 = vor.u32 %v4233_v31, %v3477_v29  ;;  %v4229_v43 = vld [vmem:[%s6446_s1 + $0x54c] sm:$0xf0]  ;;  %v3159_v14 = vld [vmem:[%s6446_s1 + $0x2f0] sm:$0xf0] }
  0x32   :  { %1514 = vmatpush.bf16.msrb.mxu2 %v3622_v26  ;;  %v3606_v38 = vor.u32 %v4265_v33, %v3605_v32  ;;  %v3333_v39 = vld [vmem:[%s6446_s1 + $0x440] sm:$0xf]  ;;  %v4261_v45 = vld [vmem:[%s6446_s1 + $0x64c] sm:$0xf0]  ;;  %v4183_v15 = vld [vmem:[%s6446_s1 + $0x3e4] sm:$0xf]  ;;  %v2794_v26 = vor.u32 %v4059_v7, %v2791_v9  ;;  %v3162_v31 = vor.u32 %v4151_v13, %v3159_v14 }
  0x33   :  { %v3461_v41 = vld [vmem:[%s6446_s1 + $0x540] sm:$0xf]  ;;  %1528 = vmatpush.bf16.msrb.mxu3 %v2858_v30  ;;  %v3334_v48 = vor.u32 %v4197_v40, %v3333_v39  ;;  %v4193_v52 = vld [vmem:[%s6446_s1 + $0x42c] sm:$0xf0]  ;;  %v3287_v17 = vld [vmem:[%s6446_s1 + $0x3f0] sm:$0xf0] }
  0x34   :  { %v3589_v44 = vld [vmem:[%s6446_s1 + $0x640] sm:$0xf]  ;;  %1487 = vmatpush.bf16.msrb.mxu0 %v3350_v36  ;;  %v3462_v49 = vor.u32 %v4229_v43, %v3461_v41  ;;  %v4225_v55 = vld [vmem:[%s6446_s1 + $0x52c] sm:$0xf0]  ;;  %v4215_v18 = vld [vmem:[%s6446_s1 + $0x4e4] sm:$0xf]  ;;  %v3290_v32 = vor.u32 %v4183_v15, %v3287_v17 }
  0x35   :  { %1501 = vmatpush.bf16.msrb.mxu1 %v3478_v37  ;;  %v3590_v50 = vor.u32 %v4261_v45, %v3589_v44  ;;  %v3317_v51 = vld [vmem:[%s6446_s1 + $0x420] sm:$0xf]  ;;  %v4257_v58 = vld [vmem:[%s6446_s1 + $0x62c] sm:$0xf0]  ;;  %v4057_v24 = vld [vmem:[%s6447_s0 + $0x28] sm:$0xf0]  ;;  %v3418_v36 = vor.u32 %v4215_v18, %v3415_v19 }
  0x36   :  { %1515 = vmatpush.bf16.msrb.mxu2 %v3606_v38  ;;  %v3445_v53 = vld [vmem:[%s6446_s1 + $0x520] sm:$0xf]  ;;  %v3318_v62 = vor.u32 %v4193_v52, %v3317_v51  ;;  %v4189_v63 = vld [vmem:[%s6446_s1 + $0x40c] sm:$0xf0]  ;;  %v2785_v25 = vld [vmem:[%s6447_s0 + $0x18] sm:$0xf] }
  0x37   :  { %1529 = vmatpush.bf16.msrb.mxu3 %v2842_v42  ;;  %v3573_v56 = vld [vmem:[%s6446_s1 + $0x620] sm:$0xf]  ;;  %v4221_v2 = vld [vmem:[%s6446_s1 + $0x50c] sm:$0xf0]  ;;  %v3446_v3 = vor.u32 %v4225_v55, %v3445_v53  ;;  %v4058_v28 = vld [vmem:[%s6447_s0 + $0x30] sm:$0xf0] }
  0x38   :  { %v3301_v61 = vld [vmem:[%s6446_s1 + $0x400] sm:$0xf]  ;;  %1488 = vmatpush.bf16.msrb.mxu0 %v3334_v48  ;;  %v3574_v4 = vor.u32 %v4257_v58, %v3573_v56  ;;  %v4253_v6 = vld [vmem:[%s6446_s1 + $0x60c] sm:$0xf0]  ;;  %v4054_v29 = vld [vmem:[%s6447_s0 + $0x14] sm:$0xf]  ;;  %v4922_v41 = vor.u32 %v4058_v28, %v2785_v25 }
  0x39   :  { %v3429_v1 = vld [vmem:[%s6446_s1 + $0x500] sm:$0xf]  ;;  %1502 = vmatpush.bf16.msrb.mxu1 %v3462_v49  ;;  %v3302_v16 = vor.u32 %v4189_v63, %v3301_v61  ;;  %v2777_v22 = vld [vmem:[%s6447_s0 + $0x10] sm:$0xf]  ;;  %v4115_v33 = vld [vmem:[%s6446_s1 + $0x1c4] sm:$0xf] }
  0x3a   :  { %1516 = vmatpush.bf16.msrb.mxu2 %v3590_v50  ;;  %v3557_v5 = vld [vmem:[%s6446_s1 + $0x600] sm:$0xf]  ;;  %v3430_v20 = vor.u32 %v4221_v2, %v3429_v1  ;;  %v2779_v30 = vld [vmem:[%s6447_s0 + $0x2c] sm:$0xf0]  ;;  %v4911_v37 = vor.u32 %v4057_v24, %v2777_v22  ;;  %v3143_v38 = vld [vmem:[%s6446_s1 + $0x2d0] sm:$0xf0]  ;;  %v3018_v45 = vor.u32 %v4115_v33, %v3015_v34 }
  0x3b   :  { %1530 = vmatpush.bf16.msrb.mxu3 %v2826_v54  ;;  %v3558_v21 = vor.u32 %v4253_v6, %v3557_v5  ;;  %v4179_v39 = vld [vmem:[%s6446_s1 + $0x3c4] sm:$0xf]  ;;  %v3271_v40 = vld [vmem:[%s6446_s1 + $0x3d0] sm:$0xf0]  ;;  %v4924_v42 = vor.u32 %v4054_v29, %v2779_v30  ;;  %v3146_v46 = vor.u32 %v4147_v35, %v3143_v38 }
  0x3c   :  { %1489 = vmatpush.bf16.msrb.mxu0 %v3318_v62  ;;  %v4211_v43 = vld [vmem:[%s6446_s1 + $0x4c4] sm:$0xf]  ;;  %v3399_v44 = vld [vmem:[%s6446_s1 + $0x4d0] sm:$0xf0]  ;;  %v3274_v47 = vor.u32 %v4179_v39, %v3271_v40 }
  0x3d   :  { %1503 = vmatpush.bf16.msrb.mxu1 %v3446_v3  ;;  %v4111_v48 = vld [vmem:[%s6446_s1 + $0x1a4] sm:$0xf]  ;;  %v2999_v49 = vld [vmem:[%s6446_s1 + $0x1b0] sm:$0xf0]  ;;  %v3402_v51 = vor.u32 %v4211_v43, %v3399_v44 }
  0x3e   :  { %1517 = vmatpush.bf16.msrb.mxu2 %v3574_v4  ;;  %v4143_v50 = vld [vmem:[%s6446_s1 + $0x2a4] sm:$0xf]  ;;  %v3127_v52 = vld [vmem:[%s6446_s1 + $0x2b0] sm:$0xf0]  ;;  %v3002_v58 = vor.u32 %v4111_v48, %v2999_v49 }
  0x3f   :  { %1531 = vmatpush.bf16.msrb.mxu3 %v2810_v8  ;;  %v4175_v53 = vld [vmem:[%s6446_s1 + $0x3a4] sm:$0xf]  ;;  %v3255_v54 = vld [vmem:[%s6446_s1 + $0x3b0] sm:$0xf0]  ;;  %v3130_v59 = vor.u32 %v4143_v50, %v3127_v52 }
  0x40   :  { %1490 = vmatpush.bf16.msrb.mxu0 %v3302_v16  ;;  %v4207_v55 = vld [vmem:[%s6446_s1 + $0x4a4] sm:$0xf]  ;;  %v3383_v56 = vld [vmem:[%s6446_s1 + $0x4b0] sm:$0xf0]  ;;  %v3258_v60 = vor.u32 %v4175_v53, %v3255_v54 }
  0x41   :  { %1504 = vmatpush.bf16.msrb.mxu1 %v3430_v20  ;;  %v4107_v61 = vld [vmem:[%s6446_s1 + $0x184] sm:$0xf]  ;;  %v2983_v62 = vld [vmem:[%s6446_s1 + $0x190] sm:$0xf0]  ;;  %v3386_v1 = vor.u32 %v4207_v55, %v3383_v56 }
  0x42   :  { %1518 = vmatpush.bf16.msrb.mxu2 %v3558_v21  ;;  %v4139_v63 = vld [vmem:[%s6446_s1 + $0x284] sm:$0xf]  ;;  %v3111_v2 = vld [vmem:[%s6446_s1 + $0x290] sm:$0xf0]  ;;  %v2986_v7 = vor.u32 %v4107_v61, %v2983_v62 }
  0x43   :  { %1532 = vmatpush.bf16.msrb.mxu3 %v2794_v26  ;;  %1491 = vmatmul.bf16.vlgmr.msrb.gmra.mxu0 %v4911_v37  ;;  %v4171_v3 = vld [vmem:[%s6446_s1 + $0x384] sm:$0xf]  ;;  %v3239_v4 = vld [vmem:[%s6446_s1 + $0x390] sm:$0xf0]  ;;  %v3114_v8 = vor.u32 %v4139_v63, %v3111_v2 }
  0x44   :  { %1539 = vmatpush.bf16.msra.mxu0 %v3034_v27  ;;  %1505 = vmatmul.bf16.vlgmr.msrb.gmra.mxu1 %v4924_v42  ;;  %v4203_v5 = vld [vmem:[%s6446_s1 + $0x484] sm:$0xf]  ;;  %v3367_v6 = vld [vmem:[%s6446_s1 + $0x490] sm:$0xf0]  ;;  %v3242_v9 = vor.u32 %v4171_v3, %v3239_v4  ;;  %v2909_v3 = vld [vmem:[%s6446_s1 + $0xe8] sm:$0xf] }
  0x45   :  { %1553 = vmatpush.bf16.msra.mxu1 %v3162_v31  ;;  %1519 = vmatmul.bf16.vlgmr.msrb.gmra.mxu2 %v4922_v41  ;;  %v4103_v10 = vld [vmem:[%s6446_s1 + $0x164] sm:$0xf]  ;;  %v2967_v12 = vld [vmem:[%s6446_s1 + $0x170] sm:$0xf0]  ;;  %v3370_v14 = vor.u32 %v4203_v5, %v3367_v6  ;;  %v4090_v4 = vld [vmem:[%s6446_s1 + $0xf4] sm:$0xf0] }
  0x46   :  { %1567 = vmatpush.bf16.msra.mxu2 %v3290_v32  ;;  %1533 = vmatmul.bf16.vlgmr.msrb.gmra.mxu3 %v4692_v57  ;;  %v4135_v13 = vld [vmem:[%s6446_s1 + $0x264] sm:$0xf]  ;;  %v3095_v15 = vld [vmem:[%s6446_s1 + $0x270] sm:$0xf0]  ;;  %v2970_v20 = vor.u32 %v4103_v10, %v2967_v12 }
  0x47   :  { %1581 = vmatpush.bf16.msra.mxu3 %v3418_v36  ;;  %v4167_v16 = vld [vmem:[%s6446_s1 + $0x364] sm:$0xf]  ;;  %v3223_v17 = vld [vmem:[%s6446_s1 + $0x370] sm:$0xf0]  ;;  %v3098_v21 = vor.u32 %v4135_v13, %v3095_v15  ;;  %v2910_v13 = vor.u32 %v4090_v4, %v2909_v3 }
  0x48   :  { %1540 = vmatpush.bf16.msra.mxu0 %v3018_v45  ;;  %v4199_v18 = vld [vmem:[%s6446_s1 + $0x464] sm:$0xf]  ;;  %v3351_v19 = vld [vmem:[%s6446_s1 + $0x470] sm:$0xf0]  ;;  %v3226_v22 = vor.u32 %v4167_v16, %v3223_v17 }
  0x49   :  { %1554 = vmatpush.bf16.msra.mxu1 %v3146_v46  ;;  %v4099_v24 = vld [vmem:[%s6446_s1 + $0x144] sm:$0xf]  ;;  %v2951_v25 = vld [vmem:[%s6446_s1 + $0x150] sm:$0xf0]  ;;  %v3354_v27 = vor.u32 %v4199_v18, %v3351_v19  ;;  %v2893_v19 = vld [vmem:[%s6446_s1 + $0xc8] sm:$0xf] }
  0x4a   :  { %1568 = vmatpush.bf16.msra.mxu2 %v3274_v47  ;;  %v4131_v26 = vld [vmem:[%s6446_s1 + $0x244] sm:$0xf]  ;;  %v3079_v28 = vld [vmem:[%s6446_s1 + $0x250] sm:$0xf0]  ;;  %v2954_v33 = vor.u32 %v4099_v24, %v2951_v25 }
  0x4b   :  { %1582 = vmatpush.bf16.msra.mxu3 %v3402_v51  ;;  %v4163_v29 = vld [vmem:[%s6446_s1 + $0x344] sm:$0xf]  ;;  %v3207_v30 = vld [vmem:[%s6446_s1 + $0x350] sm:$0xf0]  ;;  %v3082_v34 = vor.u32 %v4131_v26, %v3079_v28 }
  0x4c   :  { %1541 = vmatpush.bf16.msra.mxu0 %v3002_v58  ;;  %v4195_v31 = vld [vmem:[%s6446_s1 + $0x444] sm:$0xf]  ;;  %v3335_v32 = vld [vmem:[%s6446_s1 + $0x450] sm:$0xf0]  ;;  %v3210_v35 = vor.u32 %v4163_v29, %v3207_v30 }
  0x4d   :  { %1555 = vmatpush.bf16.msra.mxu1 %v3130_v59  ;;  %v4095_v36 = vld [vmem:[%s6446_s1 + $0x124] sm:$0xf]  ;;  %v2935_v38 = vld [vmem:[%s6446_s1 + $0x130] sm:$0xf0]  ;;  %v3338_v40 = vor.u32 %v4195_v31, %v3335_v32  ;;  %v2877_v32 = vld [vmem:[%s6446_s1 + $0xa8] sm:$0xf] }
  0x4e   :  { %1569 = vmatpush.bf16.msra.mxu2 %v3258_v60  ;;  %v4127_v39 = vld [vmem:[%s6446_s1 + $0x224] sm:$0xf]  ;;  %v3063_v43 = vld [vmem:[%s6446_s1 + $0x230] sm:$0xf0]  ;;  %v2938_v48 = vor.u32 %v4095_v36, %v2935_v38 }
  0x4f   :  { %1583 = vmatpush.bf16.msra.mxu3 %v3386_v1  ;;  %v4159_v44 = vld [vmem:[%s6446_s1 + $0x324] sm:$0xf]  ;;  %v3191_v45 = vld [vmem:[%s6446_s1 + $0x330] sm:$0xf0]  ;;  %v3066_v51 = vor.u32 %v4127_v39, %v3063_v43 }
  0x50   :  { %1542 = vmatpush.bf16.msra.mxu0 %v2986_v7  ;;  %v4191_v46 = vld [vmem:[%s6446_s1 + $0x424] sm:$0xf]  ;;  %v3319_v47 = vld [vmem:[%s6446_s1 + $0x430] sm:$0xf0]  ;;  %v3194_v52 = vor.u32 %v4159_v44, %v3191_v45  ;;  %v3037_v7 = vld [vmem:[%s6446_s1 + $0x1e8] sm:$0xf] }
  0x51   :  { %1556 = vmatpush.bf16.msra.mxu1 %v3114_v8  ;;  %v4091_v49 = vld [vmem:[%s6446_s1 + $0x104] sm:$0xf]  ;;  %v2919_v50 = vld [vmem:[%s6446_s1 + $0x110] sm:$0xf0]  ;;  %v3322_v56 = vor.u32 %v4191_v46, %v3319_v47  ;;  %v4122_v8 = vld [vmem:[%s6446_s1 + $0x1f4] sm:$0xf0] }
  0x52   :  { %1570 = vmatpush.bf16.msra.mxu2 %v3242_v9  ;;  %v4123_v53 = vld [vmem:[%s6446_s1 + $0x204] sm:$0xf]  ;;  %v3047_v54 = vld [vmem:[%s6446_s1 + $0x210] sm:$0xf0]  ;;  %v2922_v1 = vor.u32 %v4091_v49, %v2919_v50  ;;  %v3038_v17 = vor.u32 %v4122_v8, %v3037_v7  ;;  %v2861_v47 = vld [vmem:[%s6446_s1 + $0x88] sm:$0xf] }
  0x53   :  { %1584 = vmatpush.bf16.msra.mxu3 %v3370_v14  ;;  %v4155_v55 = vld [vmem:[%s6446_s1 + $0x304] sm:$0xf]  ;;  %v3175_v58 = vld [vmem:[%s6446_s1 + $0x310] sm:$0xf0]  ;;  %v3050_v5 = vor.u32 %v4123_v53, %v3047_v54  ;;  %v2989_v49 = vld [vmem:[%s6446_s1 + $0x188] sm:$0xf] }
  0x54   :  { %1543 = vmatpush.bf16.msra.mxu0 %v2970_v20  ;;  %v4187_v59 = vld [vmem:[%s6446_s1 + $0x404] sm:$0xf]  ;;  %v3303_v60 = vld [vmem:[%s6446_s1 + $0x410] sm:$0xf0]  ;;  %v3178_v6 = vor.u32 %v4155_v55, %v3175_v58  ;;  %v4086_v20 = vld [vmem:[%s6446_s1 + $0xd4] sm:$0xf0] }
  0x55   :  { %1557 = vmatpush.bf16.msra.mxu1 %v3098_v21  ;;  %v4247_v61 = vld [vmem:[%s6446_s1 + $0x5e4] sm:$0xf]  ;;  %v3543_v62 = vld [vmem:[%s6446_s1 + $0x5f0] sm:$0xf0]  ;;  %v3306_v9 = vor.u32 %v4187_v59, %v3303_v60  ;;  %v3021_v21 = vld [vmem:[%s6446_s1 + $0x1c8] sm:$0xf]  ;;  %v2894_v26 = vor.u32 %v4086_v20, %v2893_v19 }
  0x56   :  { %1571 = vmatpush.bf16.msra.mxu2 %v3226_v22  ;;  %v4279_v63 = vld [vmem:[%s6446_s1 + $0x6e4] sm:$0xf]  ;;  %v3671_v2 = vld [vmem:[%s6446_s1 + $0x6f0] sm:$0xf0]  ;;  %v3546_v10 = vor.u32 %v4247_v61, %v3543_v62  ;;  %v4118_v22 = vld [vmem:[%s6446_s1 + $0x1d4] sm:$0xf0] }
  0x57   :  { %1585 = vmatpush.bf16.msra.mxu3 %v3354_v27  ;;  %v3674_v12 = vor.u32 %v4279_v63, %v3671_v2  ;;  %v4243_v14 = vld [vmem:[%s6446_s1 + $0x5c4] sm:$0xf]  ;;  %v3527_v15 = vld [vmem:[%s6446_s1 + $0x5d0] sm:$0xf0]  ;;  %v3022_v30 = vor.u32 %v4118_v22, %v3021_v21  ;;  %v4110_v50 = vld [vmem:[%s6446_s1 + $0x194] sm:$0xf0] }
  0x58   :  { %1544 = vmatpush.bf16.msra.mxu0 %v2954_v33  ;;  %v4275_v16 = vld [vmem:[%s6446_s1 + $0x6c4] sm:$0xf]  ;;  %v3655_v18 = vld [vmem:[%s6446_s1 + $0x6d0] sm:$0xf0]  ;;  %v3530_v24 = vor.u32 %v4243_v14, %v3527_v15  ;;  %v4082_v33 = vld [vmem:[%s6446_s1 + $0xb4] sm:$0xf0]  ;;  %v2990_v58 = vor.u32 %v4110_v50, %v2989_v49 }
  0x59   :  { %1558 = vmatpush.bf16.msra.mxu1 %v3082_v34  ;;  %v3658_v25 = vor.u32 %v4275_v16, %v3655_v18  ;;  %v4239_v27 = vld [vmem:[%s6446_s1 + $0x5a4] sm:$0xf]  ;;  %v3511_v28 = vld [vmem:[%s6446_s1 + $0x5b0] sm:$0xf0]  ;;  %v3005_v34 = vld [vmem:[%s6446_s1 + $0x1a8] sm:$0xf]  ;;  %v2878_v39 = vor.u32 %v4082_v33, %v2877_v32 }
  0x5a   :  { %1572 = vmatpush.bf16.msra.mxu2 %v3210_v35  ;;  %v4271_v29 = vld [vmem:[%s6446_s1 + $0x6a4] sm:$0xf]  ;;  %v3639_v31 = vld [vmem:[%s6446_s1 + $0x6b0] sm:$0xf0]  ;;  %v4114_v35 = vld [vmem:[%s6446_s1 + $0x1b4] sm:$0xf0]  ;;  %v3514_v36 = vor.u32 %v4239_v27, %v3511_v28 }
  0x5b   :  { %1586 = vmatpush.bf16.msra.mxu3 %v3338_v40  ;;  %v3642_v38 = vor.u32 %v4271_v29, %v3639_v31  ;;  %v4235_v40 = vld [vmem:[%s6446_s1 + $0x584] sm:$0xf]  ;;  %v3495_v43 = vld [vmem:[%s6446_s1 + $0x590] sm:$0xf0]  ;;  %v3006_v45 = vor.u32 %v4114_v35, %v3005_v34  ;;  %v2845_v60 = vld [vmem:[%s6446_s1 + $0x68] sm:$0xf] }
  0x5c   :  { %1545 = vmatpush.bf16.msra.mxu0 %v2938_v48  ;;  %v4267_v44 = vld [vmem:[%s6446_s1 + $0x684] sm:$0xf]  ;;  %v3623_v46 = vld [vmem:[%s6446_s1 + $0x690] sm:$0xf0]  ;;  %v4078_v48 = vld [vmem:[%s6446_s1 + $0x94] sm:$0xf0] }
  0x5d   :  { %1559 = vmatpush.bf16.msra.mxu1 %v3066_v51  ;;  %v3498_v51 = vor.u32 %v4235_v40, %v3495_v43  ;;  %v2862_v53 = vor.u32 %v4078_v48, %v2861_v47  ;;  %v4231_v54 = vld [vmem:[%s6446_s1 + $0x564] sm:$0xf]  ;;  %v3479_v55 = vld [vmem:[%s6446_s1 + $0x570] sm:$0xf0]  ;;  %v4074_v61 = vld [vmem:[%s6446_s1 + $0x74] sm:$0xf0] }
  0x5e   :  { %1573 = vmatpush.bf16.msra.mxu2 %v3194_v52  ;;  %v3626_v52 = vor.u32 %v4267_v44, %v3623_v46  ;;  %v3607_v59 = vld [vmem:[%s6446_s1 + $0x670] sm:$0xf0]  ;;  %v2973_v62 = vld [vmem:[%s6446_s1 + $0x168] sm:$0xf]  ;;  %v4106_v63 = vld [vmem:[%s6446_s1 + $0x174] sm:$0xf0]  ;;  %v2846_v3 = vor.u32 %v4074_v61, %v2845_v60 }
  0x5f   :  { %1587 = vmatpush.bf16.msra.mxu3 %v3322_v56  ;;  %v4263_v56 = vld [vmem:[%s6446_s1 + $0x664] sm:$0xf]  ;;  %v2974_v7 = vor.u32 %v4106_v63, %v2973_v62  ;;  %v3591_v8 = vld [vmem:[%s6446_s1 + $0x650] sm:$0xf0]  ;;  %v2813_v22 = vld [vmem:[%s6446_s1 + $0x28] sm:$0xf] }
  0x60   :  { %1546 = vmatpush.bf16.msra.mxu0 %v2922_v1  ;;  %v3482_v1 = vor.u32 %v4231_v54, %v3479_v55  ;;  %v3610_v2 = vor.u32 %v4263_v56, %v3607_v59  ;;  %v4227_v4 = vld [vmem:[%s6446_s1 + $0x544] sm:$0xf]  ;;  %v3447_v18 = vld [vmem:[%s6446_s1 + $0x530] sm:$0xf0]  ;;  %v2797_v34 = vld [vmem:[%s6446_s1 + $0x8] sm:$0xf] }
  0x61   :  { %1560 = vmatpush.bf16.msra.mxu1 %v3050_v5  ;;  %v3463_v5 = vld [vmem:[%s6446_s1 + $0x550] sm:$0xf0]  ;;  %v4255_v19 = vld [vmem:[%s6446_s1 + $0x624] sm:$0xf]  ;;  %v3165_v40 = vld [vmem:[%s6446_s1 + $0x2e8] sm:$0xf] }
  0x62   :  { %1574 = vmatpush.bf16.msra.mxu2 %v3178_v6  ;;  %v4259_v6 = vld [vmem:[%s6446_s1 + $0x644] sm:$0xf]  ;;  %v3466_v14 = vor.u32 %v4227_v4, %v3463_v5  ;;  %v3575_v21 = vld [vmem:[%s6446_s1 + $0x630] sm:$0xf0]  ;;  %v4154_v43 = vld [vmem:[%s6446_s1 + $0x2f4] sm:$0xf0] }
  0x63   :  { %1588 = vmatpush.bf16.msra.mxu3 %v3306_v9  ;;  %1547 = vmatmul.bf16.vlgmr.msra.gmra.mxu0 %v4734_v11  ;;  %v2829_v9 = vld [vmem:[%s6446_s1 + $0x48] sm:$0xf]  ;;  %v3594_v15 = vor.u32 %v4259_v6, %v3591_v8  ;;  %v4219_v28 = vld [vmem:[%s6446_s1 + $0x504] sm:$0xf]  ;;  %v3431_v29 = vld [vmem:[%s6446_s1 + $0x510] sm:$0xf0]  ;;  %v3166_v54 = vor.u32 %v4154_v43, %v3165_v40 }
  0x64   :  { %1595 = vmatpush.bf16.msrb.mxu0 %v3546_v10  ;;  %1561 = vmatmul.bf16.vlgmr.msra.gmra.mxu1 %v4706_v0  ;;  %v4070_v10 = vld [vmem:[%s6446_s1 + $0x54] sm:$0xf0]  ;;  %v4251_v32 = vld [vmem:[%s6446_s1 + $0x604] sm:$0xf]  ;;  %v3559_v33 = vld [vmem:[%s6446_s1 + $0x610] sm:$0xf0] }
  0x65   :  { %1609 = vmatpush.bf16.msrb.mxu1 %v3674_v12  ;;  %1575 = vmatmul.bf16.vlgmr.msra.gmra.mxu2 %v4761_v23  ;;  %v2957_v12 = vld [vmem:[%s6446_s1 + $0x148] sm:$0xf]  ;;  %v2830_v16 = vor.u32 %v4070_v10, %v2829_v9  ;;  %v4186_v46 = vld [vmem:[%s6446_s1 + $0x3f4] sm:$0xf0]  ;;  %v3562_v49 = vor.u32 %v4251_v32, %v3559_v33 }
  0x66   :  { %1623 = vmatpush.bf16.msrb.mxu2 %v2910_v13  ;;  %1589 = vmatmul.bf16.vlgmr.msra.gmra.mxu3 %v4911_v37  ;;  %v4102_v13 = vld [vmem:[%s6446_s1 + $0x154] sm:$0xf0]  ;;  %v3293_v44 = vld [vmem:[%s6446_s1 + $0x3e8] sm:$0xf] }
  0x67   :  { %1637 = vmatpush.bf16.msrb.mxu3 %v3038_v17  ;;  %v4223_v17 = vld [vmem:[%s6446_s1 + $0x524] sm:$0xf]  ;;  %v2958_v20 = vor.u32 %v4102_v13, %v2957_v12  ;;  %v3421_v47 = vld [vmem:[%s6446_s1 + $0x4e8] sm:$0xf]  ;;  %v4218_v48 = vld [vmem:[%s6446_s1 + $0x4f4] sm:$0xf0]  ;;  %v3294_v55 = vor.u32 %v4186_v46, %v3293_v44 }
  0x68   :  { %1596 = vmatpush.bf16.msrb.mxu0 %v3530_v24  ;;  %v4066_v24 = vld [vmem:[%s6446_s1 + $0x34] sm:$0xf0]  ;;  %v3450_v27 = vor.u32 %v4223_v17, %v3447_v18  ;;  %v3422_v56 = vor.u32 %v4218_v48, %v3421_v47  ;;  %v3277_v60 = vld [vmem:[%s6446_s1 + $0x3c8] sm:$0xf] }
  0x69   :  { %1610 = vmatpush.bf16.msrb.mxu1 %v3658_v25  ;;  %v2941_v25 = vld [vmem:[%s6446_s1 + $0x128] sm:$0xf]  ;;  %v2814_v31 = vor.u32 %v4066_v24, %v2813_v22  ;;  %v4150_v59 = vld [vmem:[%s6446_s1 + $0x2d4] sm:$0xf0] }
  0x6a   :  { %1624 = vmatpush.bf16.msrb.mxu2 %v2894_v26  ;;  %v4098_v26 = vld [vmem:[%s6446_s1 + $0x134] sm:$0xf0]  ;;  %v3405_v63 = vld [vmem:[%s6446_s1 + $0x4c8] sm:$0xf] }
  0x6b   :  { %1638 = vmatpush.bf16.msrb.mxu3 %v3022_v30  ;;  %v3578_v30 = vor.u32 %v4255_v19, %v3575_v21  ;;  %v2942_v35 = vor.u32 %v4098_v26, %v2941_v25  ;;  %v4182_v62 = vld [vmem:[%s6446_s1 + $0x3d4] sm:$0xf0]  ;;  %v3261_v9 = vld [vmem:[%s6446_s1 + $0x3a8] sm:$0xf] }
  0x6c   :  { %1597 = vmatpush.bf16.msrb.mxu0 %v3514_v36  ;;  %v4062_v36 = vld [vmem:[%s6446_s1 + $0x14] sm:$0xf0]  ;;  %v3278_v5 = vor.u32 %v4182_v62, %v3277_v60  ;;  %v3389_v13 = vld [vmem:[%s6446_s1 + $0x4a8] sm:$0xf] }
  0x6d   :  { %1611 = vmatpush.bf16.msrb.mxu1 %v3642_v38  ;;  %v2925_v38 = vld [vmem:[%s6446_s1 + $0x108] sm:$0xf]  ;;  %v2798_v50 = vor.u32 %v4062_v36, %v2797_v34  ;;  %v4146_v8 = vld [vmem:[%s6446_s1 + $0x2b4] sm:$0xf0] }
  0x6e   :  { %1625 = vmatpush.bf16.msrb.mxu2 %v2878_v39  ;;  %v4094_v39 = vld [vmem:[%s6446_s1 + $0x114] sm:$0xf0]  ;;  %v3245_v22 = vld [vmem:[%s6446_s1 + $0x388] sm:$0xf] }
  0x6f   :  { %1639 = vmatpush.bf16.msrb.mxu3 %v3006_v45  ;;  %v3434_v45 = vor.u32 %v4219_v28, %v3431_v29  ;;  %v4178_v12 = vld [vmem:[%s6446_s1 + $0x3b4] sm:$0xf0]  ;;  %v3373_v26 = vld [vmem:[%s6446_s1 + $0x488] sm:$0xf] }
  0x70   :  { %1598 = vmatpush.bf16.msrb.mxu0 %v3498_v51  ;;  %v3549_v51 = vld [vmem:[%s6446_s1 + $0x5e8] sm:$0xf]  ;;  %v3262_v18 = vor.u32 %v4178_v12, %v3261_v9  ;;  %v4142_v21 = vld [vmem:[%s6446_s1 + $0x294] sm:$0xf0] }
  0x71   :  { %1612 = vmatpush.bf16.msrb.mxu1 %v3626_v52  ;;  %v4250_v52 = vld [vmem:[%s6446_s1 + $0x5f4] sm:$0xf0]  ;;  %v3501_v28 = vld [vmem:[%s6446_s1 + $0x588] sm:$0xf] }
  0x72   :  { %1626 = vmatpush.bf16.msrb.mxu2 %v2862_v53  ;;  %v2926_v53 = vor.u32 %v4094_v39, %v2925_v38  ;;  %v3550_v61 = vor.u32 %v4250_v52, %v3549_v51  ;;  %v4174_v25 = vld [vmem:[%s6446_s1 + $0x394] sm:$0xf0]  ;;  %v3101_v33 = vld [vmem:[%s6446_s1 + $0x268] sm:$0xf] }
  0x73   :  { %1640 = vmatpush.bf16.msrb.mxu3 %v2990_v58  ;;  %v3149_v58 = vld [vmem:[%s6446_s1 + $0x2c8] sm:$0xf]  ;;  %v4238_v29 = vld [vmem:[%s6446_s1 + $0x594] sm:$0xf0] }
  0x74   :  { %1599 = vmatpush.bf16.msrb.mxu0 %v3482_v1  ;;  %v4214_v1 = vld [vmem:[%s6446_s1 + $0x4d4] sm:$0xf0]  ;;  %v3150_v4 = vor.u32 %v4150_v59, %v3149_v58  ;;  %v3502_v36 = vor.u32 %v4238_v29, %v3501_v28  ;;  %v3357_v39 = vld [vmem:[%s6446_s1 + $0x468] sm:$0xf] }
  0x75   :  { %1613 = vmatpush.bf16.msrb.mxu1 %v3610_v2  ;;  %v3533_v2 = vld [vmem:[%s6446_s1 + $0x5c8] sm:$0xf]  ;;  %v3406_v6 = vor.u32 %v4214_v1, %v3405_v63  ;;  %v4138_v34 = vld [vmem:[%s6446_s1 + $0x274] sm:$0xf0] }
  0x76   :  { %1627 = vmatpush.bf16.msrb.mxu2 %v2846_v3  ;;  %v4246_v3 = vld [vmem:[%s6446_s1 + $0x5d4] sm:$0xf0]  ;;  %v3485_v43 = vld [vmem:[%s6446_s1 + $0x568] sm:$0xf] }
  0x77   :  { %1641 = vmatpush.bf16.msrb.mxu3 %v2974_v7  ;;  %v3133_v7 = vld [vmem:[%s6446_s1 + $0x2a8] sm:$0xf]  ;;  %v3534_v10 = vor.u32 %v4246_v3, %v3533_v2  ;;  %v4170_v38 = vld [vmem:[%s6446_s1 + $0x374] sm:$0xf0] }
  0x78   :  { %1600 = vmatpush.bf16.msrb.mxu0 %v3466_v14  ;;  %v4210_v14 = vld [vmem:[%s6446_s1 + $0x4b4] sm:$0xf0]  ;;  %v3134_v17 = vor.u32 %v4146_v8, %v3133_v7  ;;  %v3085_v48 = vld [vmem:[%s6446_s1 + $0x248] sm:$0xf] }
  0x79   :  { %1614 = vmatpush.bf16.msrb.mxu1 %v3594_v15  ;;  %v3517_v15 = vld [vmem:[%s6446_s1 + $0x5a8] sm:$0xf]  ;;  %v3390_v19 = vor.u32 %v4210_v14, %v3389_v13  ;;  %v4202_v40 = vld [vmem:[%s6446_s1 + $0x474] sm:$0xf0] }
  0x7a   :  { %1628 = vmatpush.bf16.msrb.mxu2 %v2830_v16  ;;  %v4242_v16 = vld [vmem:[%s6446_s1 + $0x5b4] sm:$0xf0]  ;;  %v3358_v47 = vor.u32 %v4202_v40, %v3357_v39  ;;  %v3197_v63 = vld [vmem:[%s6446_s1 + $0x328] sm:$0xf]  ;;  %v4084_v39 = vld [vmem:[%s6446_s1 + $0xcc] sm:$0xf] }
  0x7b   :  { %1642 = vmatpush.bf16.msrb.mxu3 %v2958_v20  ;;  %v3117_v20 = vld [vmem:[%s6446_s1 + $0x288] sm:$0xf]  ;;  %v3518_v24 = vor.u32 %v4242_v16, %v3517_v15  ;;  %v4234_v44 = vld [vmem:[%s6446_s1 + $0x574] sm:$0xf0] }
  0x7c   :  { %1601 = vmatpush.bf16.msrb.mxu0 %v3450_v27  ;;  %v4206_v27 = vld [vmem:[%s6446_s1 + $0x494] sm:$0xf0]  ;;  %v3486_v51 = vor.u32 %v4234_v44, %v3485_v43  ;;  %v3325_v3 = vld [vmem:[%s6446_s1 + $0x428] sm:$0xf]  ;;  %v2895_v43 = vld [vmem:[%s6446_s1 + $0xd8] sm:$0xf0] }
  0x7d   :  { %1615 = vmatpush.bf16.msrb.mxu1 %v3578_v30  ;;  %v3118_v30 = vor.u32 %v4142_v21, %v3117_v20  ;;  %v3374_v32 = vor.u32 %v4206_v27, %v3373_v26  ;;  %v4166_v52 = vld [vmem:[%s6446_s1 + $0x354] sm:$0xf0]  ;;  %v3053_v8 = vld [vmem:[%s6446_s1 + $0x208] sm:$0xf]  ;;  %v4120_v26 = vld [vmem:[%s6446_s1 + $0x1ec] sm:$0xf] }
  0x7e   :  { %1629 = vmatpush.bf16.msrb.mxu2 %v2814_v31  ;;  %v3246_v31 = vor.u32 %v4174_v25, %v3245_v22  ;;  %v4130_v62 = vld [vmem:[%s6446_s1 + $0x234] sm:$0xf0]  ;;  %v3181_v13 = vld [vmem:[%s6446_s1 + $0x308] sm:$0xf]  ;;  %v4088_v22 = vld [vmem:[%s6446_s1 + $0xec] sm:$0xf] }
  0x7f   :  { %1643 = vmatpush.bf16.msrb.mxu3 %v2942_v35  ;;  %v3229_v35 = vld [vmem:[%s6446_s1 + $0x368] sm:$0xf]  ;;  %v4162_v2 = vld [vmem:[%s6446_s1 + $0x334] sm:$0xf0]  ;;  %v2911_v25 = vld [vmem:[%s6446_s1 + $0xf8] sm:$0xf0] }
  0x80   :  { %1602 = vmatpush.bf16.msrb.mxu0 %v3434_v45  ;;  %v3102_v45 = vor.u32 %v4138_v34, %v3101_v33  ;;  %v3230_v46 = vor.u32 %v4170_v38, %v3229_v35  ;;  %v4126_v9 = vld [vmem:[%s6446_s1 + $0x214] sm:$0xf0]  ;;  %v3309_v15 = vld [vmem:[%s6446_s1 + $0x408] sm:$0xf]  ;;  %v3039_v27 = vld [vmem:[%s6446_s1 + $0x1f8] sm:$0xf0]  ;;  %v2914_v34 = vor.u32 %v4088_v22, %v2911_v25 }
  0x81   :  { %1616 = vmatpush.bf16.msrb.mxu1 %v3562_v49  ;;  %v4134_v49 = vld [vmem:[%s6446_s1 + $0x254] sm:$0xf0]  ;;  %v3677_v20 = vld [vmem:[%s6446_s1 + $0x6e8] sm:$0xf]  ;;  %v3042_v35 = vor.u32 %v4120_v26, %v3039_v27  ;;  %v4116_v44 = vld [vmem:[%s6446_s1 + $0x1cc] sm:$0xf] }
  0x82   :  { %1630 = vmatpush.bf16.msrb.mxu2 %v2798_v50  ;;  %v3213_v50 = vld [vmem:[%s6446_s1 + $0x348] sm:$0xf]  ;;  %v3086_v58 = vor.u32 %v4134_v49, %v3085_v48  ;;  %v4158_v14 = vld [vmem:[%s6446_s1 + $0x314] sm:$0xf0]  ;;  %v2898_v49 = vor.u32 %v4084_v39, %v2895_v43  ;;  %v3103_v22 = vld [vmem:[%s6446_s1 + $0x278] sm:$0xf0] }
  0x83   :  { %1644 = vmatpush.bf16.msrb.mxu3 %v2926_v53  ;;  %1603 = vmatmul.bf16.vlgmr.msrb.gmra.mxu0 %v4924_v42  ;;  %v3341_v53 = vld [vmem:[%s6446_s1 + $0x448] sm:$0xf]  ;;  %v3214_v59 = vor.u32 %v4166_v52, %v3213_v50  ;;  %v4282_v21 = vld [vmem:[%s6446_s1 + $0x6f4] sm:$0xf0]  ;;  %v3182_v28 = vor.u32 %v4158_v14, %v3181_v13 }
  0x84   :  { %1651 = vmatpush.bf16.msra.mxu0 %v3166_v54  ;;  %1617 = vmatmul.bf16.vlgmr.msrb.gmra.mxu1 %v4922_v41  ;;  %v4198_v54 = vld [vmem:[%s6446_s1 + $0x454] sm:$0xf0]  ;;  %v3678_v33 = vor.u32 %v4282_v21, %v3677_v20  ;;  %v3613_v14 = vld [vmem:[%s6446_s1 + $0x668] sm:$0xf]  ;;  %v2975_v20 = vld [vmem:[%s6446_s1 + $0x178] sm:$0xf0] }
  0x85   :  { %1665 = vmatpush.bf16.msra.mxu1 %v3294_v55  ;;  %1631 = vmatmul.bf16.vlgmr.msrb.gmra.mxu2 %v4692_v57  ;;  %v3469_v55 = vld [vmem:[%s6446_s1 + $0x548] sm:$0xf]  ;;  %v3342_v60 = vor.u32 %v4198_v54, %v3341_v53  ;;  %v4278_v38 = vld [vmem:[%s6446_s1 + $0x6d4] sm:$0xf0]  ;;  %v4080_v53 = vld [vmem:[%s6446_s1 + $0xac] sm:$0xf] }
  0x86   :  { %1679 = vmatpush.bf16.msra.mxu2 %v3422_v56  ;;  %1645 = vmatmul.bf16.vlgmr.msrb.gmra.mxu3 %v4734_v11  ;;  %v4230_v56 = vld [vmem:[%s6446_s1 + $0x554] sm:$0xf0]  ;;  %v4136_v21 = vld [vmem:[%s6446_s1 + $0x26c] sm:$0xf]  ;;  %v3597_v27 = vld [vmem:[%s6446_s1 + $0x648] sm:$0xf] }
  0x87   :  { %1693 = vmatpush.bf16.msra.mxu3 %v3550_v61  ;;  %v3069_v61 = vld [vmem:[%s6446_s1 + $0x228] sm:$0xf]  ;;  %v3470_v1 = vor.u32 %v4230_v56, %v3469_v55  ;;  %v4274_v52 = vld [vmem:[%s6446_s1 + $0x6b4] sm:$0xf0]  ;;  %v2879_v55 = vld [vmem:[%s6446_s1 + $0xb8] sm:$0xf0] }
  0x88   :  { %1652 = vmatpush.bf16.msra.mxu0 %v3150_v4  ;;  %v4194_v4 = vld [vmem:[%s6446_s1 + $0x434] sm:$0xf0]  ;;  %v3070_v7 = vor.u32 %v4130_v62, %v3069_v61  ;;  %v4112_v56 = vld [vmem:[%s6446_s1 + $0x1ac] sm:$0xf]  ;;  %v2882_v62 = vor.u32 %v4080_v53, %v2879_v55 }
  0x89   :  { %1666 = vmatpush.bf16.msra.mxu1 %v3278_v5  ;;  %v3453_v5 = vld [vmem:[%s6446_s1 + $0x528] sm:$0xf]  ;;  %v3326_v12 = vor.u32 %v4194_v4, %v3325_v3  ;;  %v4076_v3 = vld [vmem:[%s6446_s1 + $0x8c] sm:$0xf]  ;;  %v4258_v43 = vld [vmem:[%s6446_s1 + $0x634] sm:$0xf0] }
  0x8a   :  { %1680 = vmatpush.bf16.msra.mxu2 %v3406_v6  ;;  %v4226_v6 = vld [vmem:[%s6446_s1 + $0x534] sm:$0xf0] }
  0x8b   :  { %1694 = vmatpush.bf16.msra.mxu3 %v3534_v10  ;;  %v3198_v10 = vor.u32 %v4162_v2, %v3197_v63  ;;  %v3454_v16 = vor.u32 %v4226_v6, %v3453_v5  ;;  %v4270_v2 = vld [vmem:[%s6446_s1 + $0x694] sm:$0xf0]  ;;  %v2863_v5 = vld [vmem:[%s6446_s1 + $0x98] sm:$0xf0]  ;;  %v4108_v6 = vld [vmem:[%s6446_s1 + $0x18c] sm:$0xf] }
  0x8c   :  { %1653 = vmatpush.bf16.msra.mxu0 %v3134_v17  ;;  %v4190_v17 = vld [vmem:[%s6446_s1 + $0x414] sm:$0xf0] }
  0x8d   :  { %1667 = vmatpush.bf16.msra.mxu1 %v3262_v18  ;;  %v3437_v18 = vld [vmem:[%s6446_s1 + $0x508] sm:$0xf]  ;;  %v3310_v29 = vor.u32 %v4190_v17, %v3309_v15  ;;  %v4266_v15 = vld [vmem:[%s6446_s1 + $0x674] sm:$0xf0] }
  0x8e   :  { %1681 = vmatpush.bf16.msra.mxu2 %v3390_v19  ;;  %v4222_v19 = vld [vmem:[%s6446_s1 + $0x514] sm:$0xf0] }
  0x8f   :  { %1695 = vmatpush.bf16.msra.mxu3 %v3518_v24  ;;  %v3054_v24 = vor.u32 %v4126_v9, %v3053_v8  ;;  %v4140_v8 = vld [vmem:[%s6446_s1 + $0x28c] sm:$0xf]  ;;  %v3119_v9 = vld [vmem:[%s6446_s1 + $0x298] sm:$0xf0]  ;;  %v4254_v53 = vld [vmem:[%s6446_s1 + $0x614] sm:$0xf0] }
  0x90   :  { %1654 = vmatpush.bf16.msra.mxu0 %v3118_v30  ;;  %v4152_v30 = vld [vmem:[%s6446_s1 + $0x2ec] sm:$0xf]  ;;  %v3122_v17 = vor.u32 %v4140_v8, %v3119_v9 }
  0x91   :  { %1668 = vmatpush.bf16.msra.mxu1 %v3246_v31  ;;  %v3167_v31 = vld [vmem:[%s6446_s1 + $0x2f8] sm:$0xf0] }
  0x92   :  { %1682 = vmatpush.bf16.msra.mxu2 %v3374_v32  ;;  %v3438_v32 = vor.u32 %v4222_v19, %v3437_v18  ;;  %v3170_v40 = vor.u32 %v4152_v30, %v3167_v31  ;;  %v2847_v18 = vld [vmem:[%s6446_s1 + $0x78] sm:$0xf0]  ;;  %v4104_v19 = vld [vmem:[%s6446_s1 + $0x16c] sm:$0xf]  ;;  %v3106_v30 = vor.u32 %v4136_v21, %v3103_v22 }
  0x93   :  { %1696 = vmatpush.bf16.msra.mxu3 %v3502_v36  ;;  %v3661_v36 = vld [vmem:[%s6446_s1 + $0x6c8] sm:$0xf]  ;;  %v2978_v26 = vor.u32 %v4104_v19, %v2975_v20  ;;  %v2831_v31 = vld [vmem:[%s6446_s1 + $0x58] sm:$0xf0]  ;;  %v4212_v19 = vld [vmem:[%s6446_s1 + $0x4cc] sm:$0xf] }
  0x94   :  { %1655 = vmatpush.bf16.msra.mxu0 %v3102_v45  ;;  %v3023_v45 = vld [vmem:[%s6446_s1 + $0x1d8] sm:$0xf0]  ;;  %v3662_v48 = vor.u32 %v4278_v38, %v3661_v36  ;;  %v4244_v22 = vld [vmem:[%s6446_s1 + $0x5cc] sm:$0xf] }
  0x95   :  { %1669 = vmatpush.bf16.msra.mxu1 %v3230_v46  ;;  %v4148_v46 = vld [vmem:[%s6446_s1 + $0x2cc] sm:$0xf]  ;;  %v3026_v50 = vor.u32 %v4116_v44, %v3023_v45  ;;  %v3407_v21 = vld [vmem:[%s6446_s1 + $0x4d8] sm:$0xf0] }
  0x96   :  { %1683 = vmatpush.bf16.msra.mxu2 %v3358_v47  ;;  %v3151_v47 = vld [vmem:[%s6446_s1 + $0x2d8] sm:$0xf0]  ;;  %v4064_v44 = vld [vmem:[%s6446_s1 + $0x2c] sm:$0xf] }
  0x97   :  { %1697 = vmatpush.bf16.msra.mxu3 %v3486_v51  ;;  %v3645_v51 = vld [vmem:[%s6446_s1 + $0x6a8] sm:$0xf]  ;;  %v3154_v54 = vor.u32 %v4148_v46, %v3151_v47  ;;  %v2815_v46 = vld [vmem:[%s6446_s1 + $0x38] sm:$0xf0]  ;;  %v4096_v47 = vld [vmem:[%s6446_s1 + $0x12c] sm:$0xf] }
  0x98   :  { %1656 = vmatpush.bf16.msra.mxu0 %v3086_v58  ;;  %v3007_v58 = vld [vmem:[%s6446_s1 + $0x1b8] sm:$0xf0]  ;;  %v3646_v61 = vor.u32 %v4274_v52, %v3645_v51  ;;  %v3565_v52 = vld [vmem:[%s6446_s1 + $0x608] sm:$0xf] }
  0x99   :  { %1670 = vmatpush.bf16.msra.mxu1 %v3214_v59  ;;  %v4144_v59 = vld [vmem:[%s6446_s1 + $0x2ac] sm:$0xf]  ;;  %v3010_v63 = vor.u32 %v4112_v56, %v3007_v58  ;;  %v2799_v58 = vld [vmem:[%s6446_s1 + $0x18] sm:$0xf0] }
  0x9a   :  { %1684 = vmatpush.bf16.msra.mxu2 %v3342_v60  ;;  %v3135_v60 = vld [vmem:[%s6446_s1 + $0x2b8] sm:$0xf0]  ;;  %v4060_v56 = vld [vmem:[%s6446_s1 + $0xc] sm:$0xf] }
  0x9b   :  { %1698 = vmatpush.bf16.msra.mxu3 %v3470_v1  ;;  %v3629_v1 = vld [vmem:[%s6446_s1 + $0x688] sm:$0xf]  ;;  %v3138_v4 = vor.u32 %v4144_v59, %v3135_v60  ;;  %v4092_v59 = vld [vmem:[%s6446_s1 + $0x10c] sm:$0xf]  ;;  %v2802_v8 = vor.u32 %v4060_v56, %v2799_v58 }
  0x9c   :  { %1657 = vmatpush.bf16.msra.mxu0 %v3070_v7  ;;  %v2991_v7 = vld [vmem:[%s6446_s1 + $0x198] sm:$0xf0]  ;;  %v4200_v56 = vld [vmem:[%s6446_s1 + $0x46c] sm:$0xf] }
  0x9d   :  { %1671 = vmatpush.bf16.msra.mxu1 %v3198_v10  ;;  %v3630_v10 = vor.u32 %v4270_v2, %v3629_v1  ;;  %v2994_v13 = vor.u32 %v4108_v6, %v2991_v7  ;;  %v4184_v1 = vld [vmem:[%s6446_s1 + $0x3ec] sm:$0xf]  ;;  %v3295_v2 = vld [vmem:[%s6446_s1 + $0x3f8] sm:$0xf0] }
  0x9e   :  { %1685 = vmatpush.bf16.msra.mxu2 %v3326_v12  ;;  %v2866_v12 = vor.u32 %v4076_v3, %v2863_v5  ;;  %v4216_v3 = vld [vmem:[%s6446_s1 + $0x4ec] sm:$0xf]  ;;  %v3423_v5 = vld [vmem:[%s6446_s1 + $0x4f8] sm:$0xf0] }
  0x9f   :  { %1699 = vmatpush.bf16.msra.mxu3 %v3454_v16  ;;  %v4072_v16 = vld [vmem:[%s6446_s1 + $0x6c] sm:$0xf]  ;;  %v3551_v7 = vld [vmem:[%s6446_s1 + $0x5f8] sm:$0xf0] }
  0xa0   :  { %1658 = vmatpush.bf16.msra.mxu0 %v3054_v24  ;;  %v3614_v24 = vor.u32 %v4266_v15, %v3613_v14  ;;  %v2850_v25 = vor.u32 %v4072_v16, %v2847_v18  ;;  %v4248_v6 = vld [vmem:[%s6446_s1 + $0x5ec] sm:$0xf]  ;;  %v3298_v14 = vor.u32 %v4184_v1, %v3295_v2  ;;  %v3426_v15 = vor.u32 %v4216_v3, %v3423_v5  ;;  %v3279_v18 = vld [vmem:[%s6446_s1 + $0x3d8] sm:$0xf0] }
  0xa1   :  { %1672 = vmatpush.bf16.msra.mxu1 %v3182_v28  ;;  %v4262_v28 = vld [vmem:[%s6446_s1 + $0x654] sm:$0xf0]  ;;  %v3554_v16 = vor.u32 %v4248_v6, %v3551_v7  ;;  %v3615_v1 = vld [vmem:[%s6446_s1 + $0x678] sm:$0xf0]  ;;  %v4164_v6 = vld [vmem:[%s6446_s1 + $0x34c] sm:$0xf] }
  0xa2   :  { %1686 = vmatpush.bf16.msra.mxu2 %v3310_v29  ;;  %v4068_v29 = vld [vmem:[%s6446_s1 + $0x4c] sm:$0xf]  ;;  %v3598_v36 = vor.u32 %v4262_v28, %v3597_v27  ;;  %v3410_v28 = vor.u32 %v4212_v19, %v3407_v21  ;;  %v3215_v7 = vld [vmem:[%s6446_s1 + $0x358] sm:$0xf0] }
  0xa3   :  { %1700 = vmatpush.bf16.msra.mxu3 %v3438_v32  ;;  %1659 = vmatmul.bf16.vlgmr.msra.gmra.mxu0 %v4706_v0  ;;  %v4100_v32 = vld [vmem:[%s6446_s1 + $0x14c] sm:$0xf]  ;;  %v2834_v38 = vor.u32 %v4068_v29, %v2831_v31  ;;  %v3263_v31 = vld [vmem:[%s6446_s1 + $0x3b8] sm:$0xf0] }
  0xa4   :  { %1707 = vmatpush.bf16.msrb.mxu0 %v3678_v33  ;;  %1673 = vmatmul.bf16.vlgmr.msra.gmra.mxu1 %v4761_v23  ;;  %v2959_v33 = vld [vmem:[%s6446_s1 + $0x158] sm:$0xf0]  ;;  %v4160_v19 = vld [vmem:[%s6446_s1 + $0x32c] sm:$0xf] }
  0xa5   :  { %1721 = vmatpush.bf16.msrb.mxu1 %v2914_v34  ;;  %1687 = vmatmul.bf16.vlgmr.msra.gmra.mxu2 %v4911_v37  ;;  %v4132_v34 = vld [vmem:[%s6446_s1 + $0x24c] sm:$0xf]  ;;  %v2962_v39 = vor.u32 %v4100_v32, %v2959_v33 }
  0xa6   :  { %1735 = vmatpush.bf16.msrb.mxu2 %v3042_v35  ;;  %1701 = vmatmul.bf16.vlgmr.msra.gmra.mxu3 %v4924_v42  ;;  %v3087_v35 = vld [vmem:[%s6446_s1 + $0x258] sm:$0xf0]  ;;  %v4208_v32 = vld [vmem:[%s6446_s1 + $0x4ac] sm:$0xf] }
  0xa7   :  { %1749 = vmatpush.bf16.msrb.mxu3 %v3170_v40  ;;  %v3581_v40 = vld [vmem:[%s6446_s1 + $0x628] sm:$0xf]  ;;  %v3090_v45 = vor.u32 %v4132_v34, %v3087_v35  ;;  %v3391_v34 = vld [vmem:[%s6446_s1 + $0x4b8] sm:$0xf0]  ;;  %v4240_v35 = vld [vmem:[%s6446_s1 + $0x5ac] sm:$0xf] }
  0xa8   :  { %1708 = vmatpush.bf16.msrb.mxu0 %v3662_v48  ;;  %v2943_v48 = vld [vmem:[%s6446_s1 + $0x138] sm:$0xf0]  ;;  %v3582_v51 = vor.u32 %v4258_v43, %v3581_v40  ;;  %v3394_v43 = vor.u32 %v4208_v32, %v3391_v34  ;;  %v4192_v21 = vld [vmem:[%s6446_s1 + $0x42c] sm:$0xf] }
  0xa9   :  { %1722 = vmatpush.bf16.msrb.mxu1 %v2898_v49  ;;  %v4128_v49 = vld [vmem:[%s6446_s1 + $0x22c] sm:$0xf]  ;;  %v2946_v55 = vor.u32 %v4096_v47, %v2943_v48  ;;  %v3503_v48 = vld [vmem:[%s6446_s1 + $0x598] sm:$0xf0] }
  0xaa   :  { %1736 = vmatpush.bf16.msrb.mxu2 %v3026_v50  ;;  %v3071_v50 = vld [vmem:[%s6446_s1 + $0x238] sm:$0xf0]  ;;  %v4236_v47 = vld [vmem:[%s6446_s1 + $0x58c] sm:$0xf] }
  0xab   :  { %1750 = vmatpush.bf16.msrb.mxu3 %v3154_v54  ;;  %v2818_v54 = vor.u32 %v4064_v44, %v2815_v46  ;;  %v3074_v60 = vor.u32 %v4128_v49, %v3071_v50  ;;  %v4268_v49 = vld [vmem:[%s6446_s1 + $0x68c] sm:$0xf]  ;;  %v3631_v50 = vld [vmem:[%s6446_s1 + $0x698] sm:$0xf0]  ;;  %v5794_v2 = vpop.f32.mrf.mxu1 }
  0xac   :  { %1709 = vmatpush.bf16.msrb.mxu0 %v3646_v61  ;;  %v2927_v61 = vld [vmem:[%s6446_s1 + $0x118] sm:$0xf0]  ;;  %v3634_v58 = vor.u32 %v4268_v49, %v3631_v50  ;;  %v4314_v49 = vld [vmem:[%s6448_s3 + $0xf4] sm:$0xf0] }
  0xad   :  { %1723 = vmatpush.bf16.msrb.mxu1 %v2882_v62  ;;  %v4124_v62 = vld [vmem:[%s6446_s1 + $0x20c] sm:$0xf]  ;;  %v2930_v9 = vor.u32 %v4092_v59, %v2927_v61  ;;  %v3359_v59 = vld [vmem:[%s6446_s1 + $0x478] sm:$0xf0] }
  0xae   :  { %1737 = vmatpush.bf16.msrb.mxu2 %v3010_v63  ;;  %v3055_v63 = vld [vmem:[%s6446_s1 + $0x218] sm:$0xf0] }
  0xaf   :  { %1751 = vmatpush.bf16.msrb.mxu3 %v3138_v4  ;;  %v3566_v4 = vor.u32 %v4254_v53, %v3565_v52  ;;  %v3506_v53 = vor.u32 %v4236_v47, %v3503_v48  ;;  %v3487_v61 = vld [vmem:[%s6446_s1 + $0x578] sm:$0xf0]  ;;  %v3805_v48 = vld [vmem:[%s6448_s3 + $0xf0] sm:$0xf] }
  0xb0   :  { %1710 = vmatpush.bf16.msrb.mxu0 %v3630_v10  ;;  %v4280_v10 = vld [vmem:[%s6446_s1 + $0x6ec] sm:$0xf] }
  0xb1   :  { %1724 = vmatpush.bf16.msrb.mxu1 %v2866_v12  ;;  %v3679_v12 = vld [vmem:[%s6446_s1 + $0x6f8] sm:$0xf0] }
  0xb2   :  { %1738 = vmatpush.bf16.msrb.mxu2 %v2994_v13  ;;  %v3058_v13 = vor.u32 %v4124_v62, %v3055_v63  ;;  %v3682_v20 = vor.u32 %v4280_v10, %v3679_v12  ;;  %v5786_v62 = vpop.f32.mrf.mxu0  ;;  %v4264_v63 = vld [vmem:[%s6446_s1 + $0x66c] sm:$0xf]  ;;  %v3343_v10 = vld [vmem:[%s6446_s1 + $0x458] sm:$0xf0] }
  0xb3   :  { %1752 = vmatpush.bf16.msrb.mxu3 %v3122_v17  ;;  %v4180_v17 = vld [vmem:[%s6446_s1 + $0x3cc] sm:$0xf] }
  0xb4   :  { %1711 = vmatpush.bf16.msrb.mxu0 %v3614_v24  ;;  %v3535_v24 = vld [vmem:[%s6446_s1 + $0x5d8] sm:$0xf0]  ;;  %v3282_v27 = vor.u32 %v4180_v17, %v3279_v18  ;;  %v4228_v12 = vld [vmem:[%s6446_s1 + $0x54c] sm:$0xf] }
  0xb5   :  { %1725 = vmatpush.bf16.msrb.mxu1 %v2850_v25  ;;  %v4276_v25 = vld [vmem:[%s6446_s1 + $0x6cc] sm:$0xf]  ;;  %v3538_v29 = vor.u32 %v4244_v22, %v3535_v24  ;;  %v3327_v24 = vld [vmem:[%s6446_s1 + $0x438] sm:$0xf0] }
  0xb6   :  { %1739 = vmatpush.bf16.msrb.mxu2 %v2978_v26  ;;  %v3663_v26 = vld [vmem:[%s6446_s1 + $0x6d8] sm:$0xf0] }
  0xb7   :  { %1753 = vmatpush.bf16.msrb.mxu3 %v3106_v30  ;;  %v4176_v30 = vld [vmem:[%s6446_s1 + $0x3ac] sm:$0xf]  ;;  %v3666_v33 = vor.u32 %v4276_v25, %v3663_v26  ;;  %v3455_v26 = vld [vmem:[%s6446_s1 + $0x538] sm:$0xf0] }
  0xb8   :  { %1712 = vmatpush.bf16.msrb.mxu0 %v3598_v36  ;;  %v3519_v36 = vld [vmem:[%s6446_s1 + $0x5b8] sm:$0xf0]  ;;  %v3266_v40 = vor.u32 %v4176_v30, %v3263_v31  ;;  %v4224_v25 = vld [vmem:[%s6446_s1 + $0x52c] sm:$0xf] }
  0xb9   :  { %1726 = vmatpush.bf16.msrb.mxu1 %v2834_v38  ;;  %v4272_v38 = vld [vmem:[%s6446_s1 + $0x6ac] sm:$0xf]  ;;  %v3522_v44 = vor.u32 %v4240_v35, %v3519_v36  ;;  %v3458_v34 = vor.u32 %v4224_v25, %v3455_v26  ;;  %v3183_v35 = vld [vmem:[%s6446_s1 + $0x318] sm:$0xf0]  ;;  %v3701_v26 = vld [vmem:[%s6448_s3 + $0x20] sm:$0xf] }
  0xba   :  { %1740 = vmatpush.bf16.msrb.mxu2 %v2962_v39  ;;  %v3647_v39 = vld [vmem:[%s6446_s1 + $0x6b8] sm:$0xf0]  ;;  %v4156_v31 = vld [vmem:[%s6446_s1 + $0x30c] sm:$0xf]  ;;  %v5849_v32 = vpop.f32.mrf.mxu0 }
  0xbb   :  { %1754 = vmatpush.bf16.msrb.mxu3 %v3090_v45  ;;  %v4204_v45 = vld [vmem:[%s6446_s1 + $0x48c] sm:$0xf]  ;;  %v3650_v46 = vor.u32 %v4272_v38, %v3647_v39  ;;  %v3311_v38 = vld [vmem:[%s6446_s1 + $0x418] sm:$0xf0]  ;;  %v5860_v39 = vpop.f32.mrf.mxu1  ;;  %v3186_v47 = vor.u32 %v4156_v31, %v3183_v35  ;;  %v4286_v35 = vld [vmem:[%s6448_s3 + $0x14] sm:$0xf0] }
  0xbc   :  { %1713 = vmatpush.bf16.msrb.mxu0 %v3582_v51  ;;  %v4188_v36 = vld [vmem:[%s6446_s1 + $0x40c] sm:$0xf] }
  0xbd   :  { %1727 = vmatpush.bf16.msrb.mxu1 %v2818_v54  ;;  %v4168_v54 = vld [vmem:[%s6446_s1 + $0x36c] sm:$0xf]  ;;  %v3314_v50 = vor.u32 %v4188_v36, %v3311_v38  ;;  %v3757_v36 = vld [vmem:[%s6448_s3 + $0x90] sm:$0xf]  ;;  %v4302_v38 = vld [vmem:[%s6448_s3 + $0x94] sm:$0xf0] }
  0xbe   :  { %1741 = vmatpush.bf16.msrb.mxu2 %v2946_v55  ;;  %v3231_v55 = vld [vmem:[%s6446_s1 + $0x378] sm:$0xf0] }
  0xbf   :  { %1755 = vmatpush.bf16.msrb.mxu3 %v3074_v60  ;;  %v4232_v60 = vld [vmem:[%s6446_s1 + $0x56c] sm:$0xf]  ;;  %v3234_v3 = vor.u32 %v4168_v54, %v3231_v55  ;;  %v3806_v54 = vor.u32 %v4314_v49, %v3805_v48  ;;  %v3733_v55 = vld [vmem:[%s6448_s3 + $0x60] sm:$0xf]  ;;  %v1451_v49 = vadd.f32 %v5794_v2, %v5786_v62  ;;  %v3807_v62 = vld [vmem:[%s6448_s3 + $0xf8] sm:$0xf0] }
  0xc0   :  { %1714 = vmatpush.bf16.msrb.mxu0 %v3566_v4  ;;  %v3362_v4 = vor.u32 %v4200_v56, %v3359_v59  ;;  %v3490_v5 = vor.u32 %v4232_v60, %v3487_v61  ;;  %v4296_v56 = vld [vmem:[%s6448_s3 + $0x64] sm:$0xf0]  ;;  %v3749_v48 = vld [vmem:[%s6448_s3 + $0x80] sm:$0xf] }
  0xc1   :  { %1728 = vmatpush.bf16.msrb.mxu1 %v2802_v8  ;;  %v4196_v8 = vld [vmem:[%s6446_s1 + $0x44c] sm:$0xf]  ;;  %v4312_v59 = vld [vmem:[%s6448_s3 + $0xe4] sm:$0xf0]  ;;  %v3734_v61 = vor.u32 %v4296_v56, %v3733_v55 }
  0xc2   :  { %1742 = vmatpush.bf16.msrb.mxu2 %v2930_v9  ;;  %v3618_v9 = vor.u32 %v4264_v63, %v3615_v1  ;;  %v3346_v17 = vor.u32 %v4196_v8, %v3343_v10  ;;  %v5902_v63 = vpop.f32.mrf.mxu0  ;;  %v1823_v8 = vld [vmem:[%s6449_s2] sm:$0xf]  ;;  %v4292_v10 = vld [vmem:[%s6448_s3 + $0x44] sm:$0xf0] }
  0xc3   :  { %1756 = vmatpush.bf16.msrb.mxu3 %v3058_v13  ;;  %1715 = vmatmul.bf16.vlgmr.msrb.gmra.mxu0 %v4922_v41  ;;  %v3471_v13 = vld [vmem:[%s6446_s1 + $0x558] sm:$0xf0]  ;;  %1825 = vst [vmem:[#allocation1] ss:$9 sm:$0xff] %v1823_v8 }
  0xc4   :  { %1763 = vmatpush.bf16.msra.mxu0 %v3298_v14  ;;  %1729 = vmatmul.bf16.vlgmr.msrb.gmra.mxu1 %v4692_v57  ;;  %v3375_v57 = vld [vmem:[%s6446_s1 + $0x498] sm:$0xf0]  ;;  %v4260_v14 = vld [vmem:[%s6446_s1 + $0x64c] sm:$0xf]  ;;  %v3474_v18 = vor.u32 %v4228_v12, %v3471_v13  ;;  %v4308_v12 = vld [vmem:[%s6448_s3 + $0xc4] sm:$0xf0] }
  0xc5   :  { %1777 = vmatpush.bf16.msra.mxu1 %v3426_v15  ;;  %1743 = vmatmul.bf16.vlgmr.msrb.gmra.mxu2 %v4734_v11  ;;  %v3247_v11 = vld [vmem:[%s6446_s1 + $0x398] sm:$0xf0]  ;;  %v3378_v52 = vor.u32 %v4204_v45, %v3375_v57  ;;  %v4298_v57 = vld [vmem:[%s6448_s3 + $0x74] sm:$0xf0] }
  0xc6   :  { %1791 = vmatpush.bf16.msra.mxu2 %v3554_v16  ;;  %1757 = vmatmul.bf16.vlgmr.msrb.gmra.mxu3 %v4706_v0  ;;  %v4172_v0 = vld [vmem:[%s6446_s1 + $0x38c] sm:$0xf]  ;;  %v3599_v15 = vld [vmem:[%s6446_s1 + $0x658] sm:$0xf0]  ;;  %v3218_v16 = vor.u32 %v4164_v6, %v3215_v7  ;;  %v4310_v6 = vld [vmem:[%s6448_s3 + $0xd4] sm:$0xf0] }
  0xc7   :  { %1805 = vmatpush.bf16.msra.mxu3 %v3682_v20  ;;  %v3250_v51 = vor.u32 %v4172_v0, %v3247_v11  ;;  %v3199_v20 = vld [vmem:[%s6446_s1 + $0x338] sm:$0xf0]  ;;  %v3602_v22 = vor.u32 %v4260_v14, %v3599_v15  ;;  %v4252_v0 = vld [vmem:[%s6446_s1 + $0x60c] sm:$0xf]  ;;  %v5871_v11 = vpop.f32.mrf.mxu3 }
  0xc8   :  { %1764 = vmatpush.bf16.msra.mxu0 %v3282_v27  ;;  %v5838_v27 = vpop.f32.mrf.mxu2  ;;  %v3202_v30 = vor.u32 %v4160_v19, %v3199_v20  ;;  %v3567_v45 = vld [vmem:[%s6446_s1 + $0x618] sm:$0xf0]  ;;  %v4306_v19 = vld [vmem:[%s6448_s3 + $0xb4] sm:$0xf0] }
  0xc9   :  { %1778 = vmatpush.bf16.msra.mxu1 %v3410_v28  ;;  %v4256_v28 = vld [vmem:[%s6446_s1 + $0x62c] sm:$0xf] }
  0xca   :  { %1792 = vmatpush.bf16.msra.mxu2 %v3538_v29  ;;  %v3583_v29 = vld [vmem:[%s6446_s1 + $0x638] sm:$0xf0]  ;;  %v5953_v20 = vpop.f32.mrf.mxu0 }
  0xcb   :  { %1806 = vmatpush.bf16.msra.mxu3 %v3666_v33  ;;  %v3330_v33 = vor.u32 %v4192_v21, %v3327_v24 }
  0xcc   :  { %1765 = vmatpush.bf16.msra.mxu0 %v3266_v40  ;;  %v3586_v40 = vor.u32 %v4256_v28, %v3583_v29  ;;  %v4288_v28 = vld [vmem:[%s6448_s3 + $0x24] sm:$0xf0]  ;;  %v3765_v29 = vld [vmem:[%s6448_s3 + $0xa0] sm:$0xf] }
  0xcd   :  { %1779 = vmatpush.bf16.msra.mxu1 %v3394_v43  ;;  %v4220_v43 = vld [vmem:[%s6446_s1 + $0x50c] sm:$0xf]  ;;  %v3702_v31 = vor.u32 %v4288_v28, %v3701_v26  ;;  %v1826_v28 = vld [vmem:[#allocation1] sm:$0xff] }
  0xce   :  { %1793 = vmatpush.bf16.msra.mxu2 %v3522_v44  ;;  %v3439_v44 = vld [vmem:[%s6446_s1 + $0x518] sm:$0xf0] }
  0xcf   :  { %1807 = vmatpush.bf16.msra.mxu3 %v3650_v46  ;;  %v3741_v46 = vld [vmem:[%s6448_s3 + $0x70] sm:$0xf]  ;;  %v5921_v7 = vpop.f32.mrf.mxu3 }
  0xd0   :  { %1766 = vmatpush.bf16.msra.mxu0 %v3250_v51  ;;  %v3442_v51 = vor.u32 %v4220_v43, %v3439_v44  ;;  %v5900_v60 = vpop.f32.mrf.mxu2 }
  0xd1   :  { %1780 = vmatpush.bf16.msra.mxu1 %v3378_v52  ;;  %v3570_v52 = vor.u32 %v4252_v0, %v3567_v45 }
  0xd2   :  { %1794 = vmatpush.bf16.msra.mxu2 %v3506_v53  ;;  %v3742_v53 = vor.u32 %v4298_v57, %v3741_v46  ;;  %v3758_v46 = vor.u32 %v4302_v38, %v3757_v36  ;;  %v3685_v57 = vld [vmem:[%s6448_s3] sm:$0xf] }
  0xd3   :  { %1808 = vmatpush.bf16.msra.mxu3 %v3634_v58  ;;  %v3797_v58 = vld [vmem:[%s6448_s3 + $0xe0] sm:$0xf] }
  0xd4   :  { %1767 = vmatpush.bf16.msra.mxu0 %v3234_v3  ;;  %v3798_v1 = vor.u32 %v4312_v59, %v3797_v58  ;;  %v3725_v3 = vld [vmem:[%s6448_s3 + $0x50] sm:$0xf]  ;;  %v1465_v58 = vadd.f32 %v5838_v27, %v1451_v49 }
  0xd5   :  { %1781 = vmatpush.bf16.msra.mxu1 %v3362_v4  ;;  %v4294_v4 = vld [vmem:[%s6448_s3 + $0x54] sm:$0xf0] }
  0xd6   :  { %1795 = vmatpush.bf16.msra.mxu2 %v3490_v5  ;;  %v5911_v5 = vpop.f32.mrf.mxu1 }
  0xd7   :  { %1809 = vmatpush.bf16.msra.mxu3 %v3618_v9  ;;  %v3717_v9 = vld [vmem:[%s6448_s3 + $0x40] sm:$0xf]  ;;  %v1534_v21 = vpop.f32.mrf.mxu3 }
  0xd8   :  { %1768 = vmatpush.bf16.msra.mxu0 %v3218_v16  ;;  %v3718_v13 = vor.u32 %v4292_v10, %v3717_v9  ;;  %v5939_v14 = vpop.f32.mrf.mxu2  ;;  %v3709_v16 = vld [vmem:[%s6448_s3 + $0x30] sm:$0xf]  ;;  %v4293_v10 = vld [vmem:[%s6448_s3 + $0x54] sm:$0xf] }
  0xd9   :  { %1782 = vmatpush.bf16.msra.mxu1 %v3346_v17  ;;  %v4290_v17 = vld [vmem:[%s6448_s3 + $0x34] sm:$0xf0] }
  0xda   :  { %1796 = vmatpush.bf16.msra.mxu2 %v3474_v18  ;;  %v3773_v18 = vld [vmem:[%s6448_s3 + $0xb0] sm:$0xf]  ;;  %v3710_v24 = vor.u32 %v4290_v17, %v3709_v16 }
  0xdb   :  { %1810 = vmatpush.bf16.msra.mxu3 %v3602_v22  ;;  %v3774_v25 = vor.u32 %v4306_v19, %v3773_v18 }
  0xdc   :  { %1769 = vmatpush.bf16.msra.mxu0 %v3202_v30  ;;  %v4304_v30 = vld [vmem:[%s6448_s3 + $0xa4] sm:$0xf0] }
  0xdd   :  { %1783 = vmatpush.bf16.msra.mxu1 %v3330_v33  ;;  %v3766_v33 = vor.u32 %v4304_v30, %v3765_v29 }
  0xde   :  { %1797 = vmatpush.bf16.msra.mxu2 %v3458_v34  ;;  %v5955_v22 = vpop.f32.mrf.mxu1  ;;  %v3693_v34 = vld [vmem:[%s6448_s3 + $0x10] sm:$0xf] }
  0xdf   :  { %1811 = vmatpush.bf16.msra.mxu3 %v3586_v40  ;;  %v3694_v0 = vor.u32 %v4286_v35, %v3693_v34  ;;  %v1536_v45 = vpop.f32.mrf.mxu3 }
  0xe0   :  { %1770 = vmatpush.bf16.msra.mxu0 %v3186_v47  ;;  %v5981_v40 = vpop.f32.mrf.mxu2  ;;  %v1548_v43 = vpop.f32.mrf.mxu0  ;;  %v4284_v47 = vld [vmem:[%s6448_s3 + $0x4] sm:$0xf0] }
  0xe1   :  { %1784 = vmatpush.bf16.msra.mxu1 %v3314_v50  ;;  %v4300_v50 = vld [vmem:[%s6448_s3 + $0x84] sm:$0xf0]  ;;  %v1549_v2 = vadd.f32 %v1548_v43, %v1534_v21  ;;  %v4289_v43 = vld [vmem:[%s6448_s3 + $0x34] sm:$0xf] }
  0xe2   :  { %1798 = vmatpush.bf16.msra.mxu2 %v3442_v51  ;;  %v4297_v51 = vld [vmem:[%s6448_s3 + $0x74] sm:$0xf]  ;;  %v3750_v55 = vor.u32 %v4300_v50, %v3749_v48 }
  0xe3   :  { %1812 = vmatpush.bf16.msra.mxu3 %v3570_v52  ;;  %1771 = vmatmul.bf16.vlgmr.msra.gmra.mxu0 %v4761_v23  ;;  %v3789_v23 = vld [vmem:[%s6448_s3 + $0xd0] sm:$0xf]  ;;  %v3743_v52 = vld [vmem:[%s6448_s3 + $0x78] sm:$0xf0] }
  0xe4   :  { %2270 = vmatpush.bf16.msrb.mxu0 %v3742_v53  ;;  %1785 = vmatmul.bf16.vlgmr.msra.gmra.mxu1 %v4911_v37  ;;  %v3726_v37 = vor.u32 %v4294_v4, %v3725_v3  ;;  %v4313_v53 = vld [vmem:[%s6448_s3 + $0xf4] sm:$0xf]  ;;  %v3746_v56 = vor.u32 %v4297_v51, %v3743_v52  ;;  %v4311_v4 = vld [vmem:[%s6448_s3 + $0xe4] sm:$0xf] }
  0xe5   :  { %2284 = vmatpush.bf16.msrb.mxu1 %v3806_v54  ;;  %1799 = vmatmul.bf16.vlgmr.msra.gmra.mxu2 %v4924_v42  ;;  %v3790_v42 = vor.u32 %v4310_v6, %v3789_v23  ;;  %v3686_v54 = vor.u32 %v4284_v47, %v3685_v57  ;;  %v3810_v59 = vor.u32 %v4313_v53, %v3807_v62  ;;  %v3799_v23 = vld [vmem:[%s6448_s3 + $0xe8] sm:$0xf0]  ;;  %v4287_v53 = vld [vmem:[%s6448_s3 + $0x24] sm:$0xf] }
  0xe6   :  { %1813 = vmatmul.bf16.vlgmr.msra.gmra.mxu3 %v4922_v41  ;;  %v3781_v41 = vld [vmem:[%s6448_s3 + $0xc0] sm:$0xf]  ;;  %v1562_v44 = vpop.f32.mrf.mxu1  ;;  %v3802_v9 = vor.u32 %v4311_v4, %v3799_v23  ;;  %v3703_v62 = vld [vmem:[%s6448_s3 + $0x28] sm:$0xf0]  ;;  %v4285_v23 = vld [vmem:[%s6448_s3 + $0x14] sm:$0xf] }
  0xe7   :  { %v3782_v15 = vor.u32 %v4308_v12, %v3781_v41  ;;  %v1563_v6 = vadd.f32 %v1562_v44, %v1549_v2  ;;  %v3727_v41 = vld [vmem:[%s6448_s3 + $0x58] sm:$0xf0]  ;;  %v1453_v12 = vadd.f32 %v5860_v39, %v5849_v32  ;;  %v4291_v32 = vld [vmem:[%s6448_s3 + $0x44] sm:$0xf]  ;;  %v3719_v39 = vld [vmem:[%s6448_s3 + $0x48] sm:$0xf0] }
  0xe8   :  { %2271 = vmatpush.bf16.msrb.mxu0 %v3734_v61  ;;  %v4295_v61 = vld [vmem:[%s6448_s3 + $0x64] sm:$0xf]  ;;  %v1576_v3 = vpop.f32.mrf.mxu2  ;;  %v1550_v27 = vpop.f32.mrf.mxu0  ;;  %v3730_v17 = vor.u32 %v4293_v10, %v3727_v41  ;;  %v3711_v44 = vld [vmem:[%s6448_s3 + $0x38] sm:$0xf0] }
  0xe9   :  { %2285 = vmatpush.bf16.msrb.mxu1 %v3798_v1  ;;  %v3735_v1 = vld [vmem:[%s6448_s3 + $0x68] sm:$0xf0]  ;;  %v1577_v16 = vadd.f32 %v1576_v3, %v1563_v6  ;;  %v1551_v19 = vadd.f32 %v1550_v27, %v1536_v45  ;;  %v1830_v45 = vpack.i.b16 %v1826_v28, %v1826_v28  ;;  %v3714_v51 = vor.u32 %v4289_v43, %v3711_v44  ;;  %v3695_v6 = vld [vmem:[%s6448_s3 + $0x18] sm:$0xf0] }
  0xea   :  { %v3738_v8 = vor.u32 %v4295_v61, %v3735_v1  ;;  %v3706_v61 = vor.u32 %v4287_v53, %v3703_v62  ;;  %v3845_v62 = vld [vmem:[%s6448_s3 + $0x140] sm:$0xf] }
  0xeb   :  { %v1832_v2 = vperm.slane %v1830_v45, 0  ;;  %v3861_v45 = vld [vmem:[%s6448_s3 + $0x160] sm:$0xf] }
  0xec   :  { %2272 = vmatpush.bf16.msrb.mxu0 %v3726_v37  ;;  %v1479_v37 = vadd.f32 %v5871_v11, %v1465_v58  ;;  %v3791_v11 = vld [vmem:[%s6448_s3 + $0xd8] sm:$0xf0] }
  0xed   :  { %2286 = vmatpush.bf16.msrb.mxu1 %v3790_v42 }
  0xee   :  { %v1564_v42 = vpop.f32.mrf.mxu1  ;;  %v1493_v18 = vadd.f32 %v5902_v63, %v1479_v37  ;;  %v3783_v63 = vld [vmem:[%s6448_s3 + $0xc8] sm:$0xf0]  ;;  %v3759_v37 = vld [vmem:[%s6448_s3 + $0x98] sm:$0xf0] }
  0xef   :  { %v1565_v35 = vadd.f32 %v1564_v42, %v1551_v19 }
  0xf0   :  { %2273 = vmatpush.bf16.msrb.mxu0 %v3718_v13  ;;  %v1590_v13 = vpop.f32.mrf.mxu3  ;;  %v1578_v29 = vpop.f32.mrf.mxu2  ;;  %v1507_v34 = vadd.f32 %v5911_v5, %v1493_v18  ;;  %v4305_v5 = vld [vmem:[%s6448_s3 + $0xb4] sm:$0xf] }
  0xf1   :  { %2287 = vmatpush.bf16.msrb.mxu1 %v3782_v15  ;;  %v4309_v15 = vld [vmem:[%s6448_s3 + $0xd4] sm:$0xf]  ;;  %v1591_v26 = vadd.f32 %v1590_v13, %v1577_v16  ;;  %v1579_v57 = vadd.f32 %v1578_v29, %v1565_v35  ;;  %v4299_v16 = vld [vmem:[%s6448_s3 + $0x84] sm:$0xf]  ;;  %v4330_v35 = vld [vmem:[%s6448_s3 + $0x174] sm:$0xf0] }
  0xf2   :  { %v3794_v21 = vor.u32 %v4309_v15, %v3791_v11  ;;  %v1521_v52 = vadd.f32 %v5939_v14, %v1507_v34  ;;  %v3687_v11 = vld [vmem:[%s6448_s3 + $0x8] sm:$0xf0]  ;;  %v3869_v34 = vld [vmem:[%s6448_s3 + $0x170] sm:$0xf] }
  0xf4   :  { %2274 = vmatpush.bf16.msrb.mxu0 %v3710_v24  ;;  %v1467_v24 = vadd.f32 %v5900_v60, %v1453_v12  ;;  %v3698_v12 = vor.u32 %v4285_v23, %v3695_v6  ;;  %v4338_v6 = vld [vmem:[%s6448_s3 + $0x1b4] sm:$0xf0] }
  0xf5   :  { %2288 = vmatpush.bf16.msrb.mxu1 %v3774_v25  ;;  %v4307_v25 = vld [vmem:[%s6448_s3 + $0xc4] sm:$0xf] }
  0xf6   :  { %v3786_v38 = vor.u32 %v4307_v25, %v3783_v63 }
  0xf8   :  { %2275 = vmatpush.bf16.msrb.mxu0 %v3702_v31  ;;  %v1827_v31 = vld [vmem:[#allocation1 + $0x9] sm:$0xff]  ;;  %v1592_v50 = vpop.f32.mrf.mxu3 }
  0xf9   :  { %2289 = vmatpush.bf16.msrb.mxu1 %v3766_v33  ;;  %v3722_v33 = vor.u32 %v4291_v32, %v3719_v39  ;;  %v1833_v48 = vpack.i.b16 %v1827_v31, %v1827_v31  ;;  %v1593_v14 = vadd.f32 %v1592_v50, %v1579_v57  ;;  %v4326_v50 = vld [vmem:[%s6448_s3 + $0x154] sm:$0xf0] }
  0xfc   :  { %2276 = vmatpush.bf16.msrb.mxu0 %v3694_v0  ;;  %v1481_v0 = vadd.f32 %v5921_v7, %v1467_v24 }
  0xfd   :  { %2290 = vmatpush.bf16.msrb.mxu1 %v3758_v46  ;;  %v3775_v46 = vld [vmem:[%s6448_s3 + $0xb8] sm:$0xf0] }
  0xfe   :  { %v1495_v49 = vadd.f32 %v5953_v20, %v1481_v0  ;;  %v3778_v7 = vor.u32 %v4305_v5, %v3775_v46  ;;  %v4303_v20 = vld [vmem:[%s6448_s3 + $0xa4] sm:$0xf]  ;;  %v4328_v5 = vld [vmem:[%s6448_s3 + $0x164] sm:$0xf0]  ;;  %v3925_v46 = vld [vmem:[%s6448_s3 + $0x1e0] sm:$0xf] }
  0xff   :  { %v3862_v57 = vor.u32 %v4328_v5, %v3861_v45  ;;  %v3863_v45 = vld [vmem:[%s6448_s3 + $0x168] sm:$0xf0]  ;;  %v4343_v5 = vld [vmem:[%s6448_s3 + $0x1e4] sm:$0xf] }
 0x100   :  { %2277 = vmatpush.bf16.msrb.mxu0 %v3686_v54  ;;  %v1604_v30 = vpop.f32.mrf.mxu0  ;;  %v3767_v54 = vld [vmem:[%s6448_s3 + $0xa8] sm:$0xf0]  ;;  %v1509_v58 = vadd.f32 %v5955_v22, %v1495_v49  ;;  %v4301_v22 = vld [vmem:[%s6448_s3 + $0x94] sm:$0xf]  ;;  %v3853_v49 = vld [vmem:[%s6448_s3 + $0x150] sm:$0xf] }
 0x101   :  { %2291 = vmatpush.bf16.msrb.mxu1 %v3750_v55  ;;  %v1605_v36 = vadd.f32 %v1604_v30, %v1591_v26  ;;  %v1618_v60 = vpop.f32.mrf.mxu1  ;;  %v3770_v4 = vor.u32 %v4303_v20, %v3767_v54  ;;  %v3762_v15 = vor.u32 %v4301_v22, %v3759_v37  ;;  %v3909_v20 = vld [vmem:[%s6448_s3 + $0x1c0] sm:$0xf]  ;;  %v4340_v54 = vld [vmem:[%s6448_s3 + $0x1c4] sm:$0xf0] }
 0x102   :  { %v1523_v27 = vadd.f32 %v5981_v40, %v1509_v58  ;;  %v4283_v40 = vld [vmem:[%s6448_s3 + $0x4] sm:$0xf]  ;;  %v3910_v58 = vor.u32 %v4340_v54, %v3909_v20  ;;  %v3829_v22 = vld [vmem:[%s6448_s3 + $0x120] sm:$0xf]  ;;  %v4320_v37 = vld [vmem:[%s6448_s3 + $0x124] sm:$0xf0] }
 0x103   :  { %v1619_v47 = vadd.f32 %v1618_v60, %v1605_v36  ;;  %v3690_v39 = vor.u32 %v4283_v40, %v3687_v11  ;;  %v3933_v36 = vld [vmem:[%s6448_s3 + $0x1f0] sm:$0xf]  ;;  %v3870_v60 = vor.u32 %v4330_v35, %v3869_v34  ;;  %v4318_v40 = vld [vmem:[%s6448_s3 + $0x114] sm:$0xf0]  ;;  %v3935_v34 = vld [vmem:[%s6448_s3 + $0x1f8] sm:$0xf0] }
 0x104   :  { %2326 = vmatpush.bf16.msra.mxu0 %v3746_v56  ;;  %v1835_v56 = vperm.slane %v1833_v48, 0  ;;  %v3885_v11 = vld [vmem:[%s6448_s3 + $0x190] sm:$0xf] }
 0x105   :  { %2340 = vmatpush.bf16.msra.mxu1 %v3810_v59  ;;  %v1819_v55 = vpack.c.bf16 %v1619_v47, %v1521_v52  ;;  %2298 = vmatpush.bf16.msrb.mxu2 %v3870_v60  ;;  %v4344_v47 = vld [vmem:[%s6448_s3 + $0x1e4] sm:$0xf0]  ;;  %v3854_v52 = vor.u32 %v4326_v50, %v3853_v49  ;;  %v6239_v60 = vld [vmem:[#allocation1 + $0x12] sm:$0xff] }
 0x106   :  { %v1851_v10 = vunpack.c.l.bf16 %v1835_v56  ;;  %v3926_v48 = vor.u32 %v4344_v47, %v3925_v46  ;;  %v6250_v46 = vld [vmem:[#allocation1 + $0x1b] sm:$0xff] }
 0x107   :  { %v1842_v42 = vunpack.c.l.bf16 %v1819_v55 }
 0x108   :  { %2327 = vmatpush.bf16.msra.mxu0 %v3738_v8  ;;  %v1606_v59 = vpop.f32.mrf.mxu0  ;;  %v1850_v8 = vunpack.c.l.bf16 %v1832_v2  ;;  %v6117_v43 = vpop.f32.mrf.mxu2  ;;  %v4324_v2 = vld [vmem:[%s6448_s3 + $0x144] sm:$0xf0] }
 0x109   :  { %2341 = vmatpush.bf16.msra.mxu1 %v3802_v9  ;;  %v1607_v1 = vadd.f32 %v1606_v59, %v1593_v14  ;;  %v1620_v3 = vpop.f32.mrf.mxu1  ;;  %v1843_v9 = vunpack.c.h.bf16 %v1819_v55  ;;  %v6119_v0 = vpop.f32.mrf.mxu3  ;;  %2299 = vmatpush.bf16.msrb.mxu2 %v3862_v57  ;;  %v3846_v56 = vor.u32 %v4324_v2, %v3845_v62  ;;  %v2384_v57 = vld [vmem:[%s6450_s4] sm:$0x3]  ;;  %v3919_v2 = vld [vmem:[%s6448_s3 + $0x1d8] sm:$0xf0] }
 0x10a   :  { %v1854_v18 = vadd.f32 %v1850_v8, %v1842_v42  ;;  %v3893_v42 = vld [vmem:[%s6448_s3 + $0x1a0] sm:$0xf]  ;;  %2386 = vst [vmem:[#allocation1] ss:$9 sm:$0xff] %v2384_v57  ;;  %v3879_v57 = vld [vmem:[%s6448_s3 + $0x188] sm:$0xf0] }
 0x10b   :  { %v1621_v41 = vadd.f32 %v1620_v3, %v1607_v1  ;;  %v1855_v19 = vadd.f32 %v1851_v10, %v1843_v9  ;;  %v3837_v1 = vld [vmem:[%s6448_s3 + $0x130] sm:$0xf]  ;;  %v4322_v3 = vld [vmem:[%s6448_s3 + $0x134] sm:$0xf0] }
 0x10c   :  { %2328 = vmatpush.bf16.msra.mxu0 %v3730_v17  ;;  %v3751_v17 = vld [vmem:[%s6448_s3 + $0x88] sm:$0xf0]  ;;  %v1874_v26 = vmax.f32 %v1854_v18, 0.0  ;;  %v3838_v23 = vor.u32 %v4322_v3, %v3837_v1  ;;  %v4334_v18 = vld [vmem:[%s6448_s3 + $0x194] sm:$0xf0]  ;;  %v1647_v3 = vadd.f32 %v6119_v0, %v6117_v43 }
 0x10d   :  { %2342 = vmatpush.bf16.msra.mxu1 %v3794_v21  ;;  %v1821_v13 = vpack.c.bf16 %v1621_v41, %v1523_v27  ;;  %v3754_v63 = vor.u32 %v4299_v16, %v3751_v17  ;;  %v1875_v28 = vmax.f32 %v1855_v19, 0.0  ;;  %2300 = vmatpush.bf16.msrb.mxu2 %v3854_v52  ;;  %v4336_v41 = vld [vmem:[%s6448_s3 + $0x1a4] sm:$0xf0]  ;;  %v3886_v19 = vor.u32 %v4334_v18, %v3885_v11  ;;  %v3855_v52 = vld [vmem:[%s6448_s3 + $0x158] sm:$0xf0] }
 0x10e   :  { %v4339_v1 = vld [vmem:[%s6448_s3 + $0x1c4] sm:$0xf]  ;;  %v4337_v43 = vld [vmem:[%s6448_s3 + $0x1b4] sm:$0xf] }
 0x10f   :  { %v1846_v21 = vunpack.c.l.bf16 %v1821_v13  ;;  %v1847_v32 = vunpack.c.h.bf16 %v1821_v13 }
 0x110   :  { %2329 = vmatpush.bf16.msra.mxu0 %v3722_v33  ;;  %v6157_v14 = vpop.f32.mrf.mxu2 }
 0x111   :  { %2343 = vmatpush.bf16.msra.mxu1 %v3786_v38  ;;  %v1858_v24 = vadd.f32 %v1850_v8, %v1846_v21  ;;  %v1859_v25 = vadd.f32 %v1851_v10, %v1847_v32  ;;  %v4346_v38 = vld [vmem:[%s6448_s3 + $0x1f4] sm:$0xf0]  ;;  %v6159_v55 = vpop.f32.mrf.mxu3  ;;  %2301 = vmatpush.bf16.msrb.mxu2 %v3846_v56  ;;  %v3830_v10 = vor.u32 %v4320_v37, %v3829_v22  ;;  %v3813_v21 = vld [vmem:[%s6448_s3 + $0x100] sm:$0xf]  ;;  %v4316_v32 = vld [vmem:[%s6448_s3 + $0x104] sm:$0xf0] }
 0x112   :  { %v3934_v44 = vor.u32 %v4346_v38, %v3933_v36  ;;  %v4323_v56 = vld [vmem:[%s6448_s3 + $0x144] sm:$0xf]  ;;  %v4321_v37 = vld [vmem:[%s6448_s3 + $0x134] sm:$0xf] }
 0x113   :  { %v1878_v29 = vmax.f32 %v1858_v24, 0.0  ;;  %v1879_v30 = vmax.f32 %v1859_v25, 0.0  ;;  %v3814_v25 = vor.u32 %v4316_v32, %v3813_v21 }
 0x114   :  { %2330 = vmatpush.bf16.msra.mxu0 %v3714_v51  ;;  %2312 = vmatpush.bf16.msrb.mxu3 %v3934_v44  ;;  %v3917_v51 = vld [vmem:[%s6448_s3 + $0x1d0] sm:$0xf]  ;;  %v4327_v44 = vld [vmem:[%s6448_s3 + $0x164] sm:$0xf] }
 0x115   :  { %2344 = vmatpush.bf16.msra.mxu1 %v3778_v7  ;;  %v1882_v31 = vpack.c.bf16 %v1878_v29, %v1874_v26  ;;  %v1883_v33 = vpack.c.bf16 %v1879_v30, %v1875_v28  ;;  %v4342_v7 = vld [vmem:[%s6448_s3 + $0x1d4] sm:$0xf0]  ;;  %2302 = vmatpush.bf16.msrb.mxu2 %v3838_v23  ;;  %v4329_v26 = vld [vmem:[%s6448_s3 + $0x174] sm:$0xf]  ;;  %v3866_v47 = vor.u32 %v4327_v44, %v3863_v45  ;;  %v3911_v23 = vld [vmem:[%s6448_s3 + $0x1c8] sm:$0xf0] }
 0x116   :  { %v3918_v53 = vor.u32 %v4342_v7, %v3917_v51  ;;  %v4325_v51 = vld [vmem:[%s6448_s3 + $0x154] sm:$0xf] }
 0x117   :  { %2278 = vmatmul.bf16.vlgmr.msrb.gmra.mxu0 %v1882_v31  ;;  %2292 = vmatmul.bf16.vlgmr.msrb.gmra.mxu1 %v1883_v33  ;;  %v4341_v7 = vld [vmem:[%s6448_s3 + $0x1d4] sm:$0xf]  ;;  %v3858_v62 = vor.u32 %v4325_v51, %v3855_v52  ;;  %v1836_v52 = vpack.i.b16 %v6239_v60, %v6239_v60 }
 0x118   :  { %2331 = vmatpush.bf16.msra.mxu0 %v3706_v61  ;;  %2313 = vmatpush.bf16.msrb.mxu3 %v3926_v48  ;;  %v3927_v48 = vld [vmem:[%s6448_s3 + $0x1e8] sm:$0xf0]  ;;  %v3922_v20 = vor.u32 %v4341_v7, %v3919_v2 }
 0x119   :  { %2345 = vmatpush.bf16.msra.mxu1 %v3770_v4  ;;  %v3901_v4 = vld [vmem:[%s6448_s3 + $0x1b0] sm:$0xf]  ;;  %2303 = vmatpush.bf16.msrb.mxu2 %v3830_v10  ;;  %v3930_v49 = vor.u32 %v4343_v5, %v3927_v48  ;;  %v3815_v5 = vld [vmem:[%s6448_s3 + $0x108] sm:$0xf0] }
 0x11a   :  { %v3902_v27 = vor.u32 %v4338_v6, %v3901_v4 }
 0x11c   :  { %2332 = vmatpush.bf16.msra.mxu0 %v3698_v12  ;;  %2314 = vmatpush.bf16.msrb.mxu3 %v3918_v53  ;;  %v3894_v12 = vor.u32 %v4336_v41, %v3893_v42  ;;  %v3839_v42 = vld [vmem:[%s6448_s3 + $0x138] sm:$0xf0] }
 0x11d   :  { %2346 = vmatpush.bf16.msra.mxu1 %v3762_v15  ;;  %v3821_v15 = vld [vmem:[%s6448_s3 + $0x110] sm:$0xf]  ;;  %v3842_v10 = vor.u32 %v4321_v37, %v3839_v42  ;;  %v3903_v41 = vld [vmem:[%s6448_s3 + $0x1b8] sm:$0xf0] }
 0x11e   :  { %v3822_v17 = vor.u32 %v4318_v40, %v3821_v15  ;;  %v3831_v15 = vld [vmem:[%s6448_s3 + $0x128] sm:$0xf0]  ;;  %v3906_v11 = vor.u32 %v4337_v43, %v3903_v41 }
 0x120   :  { %2333 = vmatpush.bf16.msra.mxu0 %v3690_v39  ;;  %v6161_v59 = vpop.f32.mrf.mxu0  ;;  %2315 = vmatpush.bf16.msrb.mxu3 %v3910_v58  ;;  %v3877_v39 = vld [vmem:[%s6448_s3 + $0x180] sm:$0xf]  ;;  %v3847_v58 = vld [vmem:[%s6448_s3 + $0x148] sm:$0xf0] }
 0x121   :  { %2347 = vmatpush.bf16.msra.mxu1 %v3754_v63  ;;  %v6163_v61 = vpop.f32.mrf.mxu1  ;;  %2304 = vmatpush.bf16.msrb.mxu2 %v3822_v17  ;;  %v4332_v63 = vld [vmem:[%s6448_s3 + $0x184] sm:$0xf0]  ;;  %v3850_v4 = vor.u32 %v4323_v56, %v3847_v58  ;;  %v1661_v0 = vadd.f32 %v6161_v59, %v1647_v3  ;;  %v4335_v17 = vld [vmem:[%s6448_s3 + $0x1a4] sm:$0xf]  ;;  %v3895_v59 = vld [vmem:[%s6448_s3 + $0x1a8] sm:$0xf0] }
 0x122   :  { %v3878_v30 = vor.u32 %v4332_v63, %v3877_v39  ;;  %v3898_v39 = vor.u32 %v4335_v17, %v3895_v59  ;;  %v1649_v63 = vadd.f32 %v6159_v55, %v6157_v14 }
 0x124   :  { %2316 = vmatpush.bf16.msrb.mxu3 %v3902_v27  ;;  %v3914_v27 = vor.u32 %v4339_v1, %v3911_v23  ;;  %v1838_v1 = vperm.slane %v1836_v52, 0 }
 0x125   :  { %2305 = vmatpush.bf16.msrb.mxu2 %v3814_v25  ;;  %v4317_v25 = vld [vmem:[%s6448_s3 + $0x114] sm:$0xf] }
 0x126   :  { %v1852_v37 = vunpack.c.l.bf16 %v1838_v1 }
 0x127   :  { %2334 = vmatmul.bf16.vlgmr.msra.gmra.mxu0 %v1882_v31  ;;  %2348 = vmatmul.bf16.vlgmr.msra.gmra.mxu1 %v1883_v33  ;;  %v3871_v31 = vld [vmem:[%s6448_s3 + $0x178] sm:$0xf0]  ;;  %v4345_v33 = vld [vmem:[%s6448_s3 + $0x1f4] sm:$0xf] }
 0x128   :  { %v6177_v8 = vpop.f32.mrf.mxu2  ;;  %v6193_v13 = vpop.f32.mrf.mxu0  ;;  %2317 = vmatpush.bf16.msrb.mxu3 %v3894_v12  ;;  %v3874_v35 = vor.u32 %v4329_v26, %v3871_v31  ;;  %v3938_v36 = vor.u32 %v4345_v33, %v3935_v34  ;;  %v4319_v12 = vld [vmem:[%s6448_s3 + $0x124] sm:$0xf]  ;;  %v1675_v26 = vadd.f32 %v6163_v61, %v1661_v0  ;;  %v3823_v31 = vld [vmem:[%s6448_s3 + $0x118] sm:$0xf0]  ;;  %v4333_v33 = vld [vmem:[%s6448_s3 + $0x194] sm:$0xf] }
 0x129   :  { %v6188_v9 = vpop.f32.mrf.mxu3  ;;  %v6204_v16 = vpop.f32.mrf.mxu1  ;;  %v3834_v32 = vor.u32 %v4319_v12, %v3831_v15  ;;  %v3887_v34 = vld [vmem:[%s6448_s3 + $0x198] sm:$0xf0]  ;;  %v3826_v14 = vor.u32 %v4317_v25, %v3823_v31  ;;  %v4315_v61 = vld [vmem:[%s6448_s3 + $0x104] sm:$0xf]  ;;  %v4361_v25 = vld [vmem:[%s6451_s5 + $0x70] sm:$0xff] }
 0x12a   :  { %2354 = vmatpush.bf16.msra.mxu2 %v3874_v35  ;;  %v3890_v55 = vor.u32 %v4333_v33, %v3887_v34  ;;  %v1689_v44 = vadd.f32 %v6177_v8, %v1675_v26  ;;  %v3818_v7 = vor.u32 %v4315_v61, %v3815_v5  ;;  %v4360_v26 = vld [vmem:[%s6451_s5 + $0x68] sm:$0xff]  ;;  %v4359_v31 = vld [vmem:[%s6451_s5 + $0x60] sm:$0xff] }
 0x12c   :  { %2318 = vmatpush.bf16.msrb.mxu3 %v3886_v19 }
 0x12e   :  { %2355 = vmatpush.bf16.msra.mxu2 %v3866_v47 }
 0x130   :  { %v6218_v24 = vpop.f32.mrf.mxu2  ;;  %2319 = vmatpush.bf16.msrb.mxu3 %v3878_v30 }
 0x131   :  { %v6226_v28 = vpop.f32.mrf.mxu3 }
 0x132   :  { %2356 = vmatpush.bf16.msra.mxu2 %v3858_v62  ;;  %v1703_v62 = vadd.f32 %v6188_v9, %v1689_v44  ;;  %v4348_v44 = vld [vmem:[%s6451_s5 + $0x8] sm:$0xff] }
 0x134   :  { %2368 = vmatpush.bf16.msra.mxu3 %v3938_v36  ;;  %v1663_v36 = vadd.f32 %v6193_v13, %v1649_v63  ;;  %v4331_v13 = vld [vmem:[%s6448_s3 + $0x184] sm:$0xf]  ;;  %v4352_v63 = vld [vmem:[%s6451_s5 + $0x28] sm:$0xff] }
 0x136   :  { %2357 = vmatpush.bf16.msra.mxu2 %v3850_v4  ;;  %v1677_v48 = vadd.f32 %v6204_v16, %v1663_v36  ;;  %v4358_v36 = vld [vmem:[%s6451_s5 + $0x58] sm:$0xff] }
 0x138   :  { %2369 = vmatpush.bf16.msra.mxu3 %v3930_v49  ;;  %v1691_v16 = vadd.f32 %v6218_v24, %v1677_v48  ;;  %v4370_v48 = vld [vmem:[%s6452_s7 + $0x38] sm:$0xff] }
 0x13a   :  { %2358 = vmatpush.bf16.msra.mxu2 %v3842_v10 }
 0x13c   :  { %2370 = vmatpush.bf16.msra.mxu3 %v3922_v20  ;;  %v1839_v20 = vpack.i.b16 %v6250_v46, %v6250_v46 }
 0x13e   :  { %2359 = vmatpush.bf16.msra.mxu2 %v3834_v32  ;;  %v1841_v4 = vperm.slane %v1839_v20, 0  ;;  %v4362_v32 = vld [vmem:[%s6451_s5 + $0x78] sm:$0xff]  ;;  %v2388_v20 = vld [vmem:[#allocation1 + $0x9] sm:$0xff] }
 0x13f   :  { %2559 = vmatpush.bf16.msrb.mxu1 %v4362_v32 }
 0x140   :  { %v6228_v29 = vpop.f32.mrf.mxu0  ;;  %2371 = vmatpush.bf16.msra.mxu3 %v3914_v27  ;;  %v1853_v24 = vunpack.c.l.bf16 %v1841_v4 }
 0x141   :  { %v1730_v38 = vpop.f32.mrf.mxu1  ;;  %v1717_v58 = vadd.f32 %v6228_v29, %v1703_v62 }
 0x142   :  { %2360 = vmatpush.bf16.msra.mxu2 %v3826_v14  ;;  %v4357_v14 = vld [vmem:[%s6451_s5 + $0x50] sm:$0xff] }
 0x143   :  { %2560 = vmatpush.bf16.msrb.mxu1 %v4361_v25 }
 0x144   :  { %2372 = vmatpush.bf16.msra.mxu3 %v3906_v11 }
 0x146   :  { %2361 = vmatpush.bf16.msra.mxu2 %v3818_v7  ;;  %v4368_v7 = vld [vmem:[%s6452_s7 + $0x28] sm:$0xff] }
 0x147   :  { %2561 = vmatpush.bf16.msrb.mxu1 %v4360_v26 }
 0x148   :  { %v1744_v50 = vpop.f32.mrf.mxu2  ;;  %v6270_v54 = vpop.f32.mrf.mxu0  ;;  %2373 = vmatpush.bf16.msra.mxu3 %v3898_v39  ;;  %v4353_v39 = vld [vmem:[%s6451_s5 + $0x30] sm:$0xff] }
 0x149   :  { %v1758_v53 = vpop.f32.mrf.mxu3  ;;  %v1732_v6 = vpop.f32.mrf.mxu1  ;;  %v1745_v22 = vadd.f32 %v1744_v50, %v1730_v38 }
 0x14b   :  { %v1759_v18 = vadd.f32 %v1758_v53, %v1745_v22  ;;  %v3882_v53 = vor.u32 %v4331_v13, %v3879_v57  ;;  %2562 = vmatpush.bf16.msrb.mxu1 %v4359_v31  ;;  %v4347_v57 = vld [vmem:[%s6451_s5] sm:$0xff] }
 0x14c   :  { %2374 = vmatpush.bf16.msra.mxu3 %v3890_v55  ;;  %v4367_v31 = vld [vmem:[%s6452_s7 + $0x20] sm:$0xff] }
 0x14f   :  { %2563 = vmatpush.bf16.msrb.mxu1 %v4358_v36  ;;  %v4363_v36 = vld [vmem:[%s6452_s7] sm:$0xff] }
 0x150   :  { %v1746_v40 = vpop.f32.mrf.mxu2  ;;  %2375 = vmatpush.bf16.msra.mxu3 %v3882_v53 }
 0x151   :  { %v1760_v19 = vpop.f32.mrf.mxu3  ;;  %v1747_v38 = vadd.f32 %v1746_v40, %v1732_v6  ;;  %v1705_v6 = vadd.f32 %v6226_v28, %v1691_v16 }
 0x153   :  { %v1761_v49 = vadd.f32 %v1760_v19, %v1747_v38  ;;  %v1719_v22 = vadd.f32 %v6270_v54, %v1705_v6  ;;  %v4354_v54 = vld [vmem:[%s6451_s5 + $0x38] sm:$0xff]  ;;  %v4349_v38 = vld [vmem:[%s6451_s5 + $0x10] sm:$0xff]  ;;  %2564 = vmatpush.bf16.msrb.mxu1 %v4357_v14 }
 0x154   :  { %2545 = vmatpush.bf16.msrb.mxu0 %v4354_v54 }
 0x158   :  { %2546 = vmatpush.bf16.msrb.mxu0 %v4353_v39 }
 0x15c   :  { %2547 = vmatpush.bf16.msrb.mxu0 %v4352_v63 }
 0x160   :  { %v1772_v21 = vpop.f32.mrf.mxu0 }
 0x161   :  { %v1773_v30 = vadd.f32 %v1772_v21, %v1759_v18  ;;  %v1786_v35 = vpop.f32.mrf.mxu1 }
 0x163   :  { %v1787_v45 = vadd.f32 %v1786_v35, %v1773_v30  ;;  %v4351_v30 = vld [vmem:[%s6451_s5 + $0x20] sm:$0xff]  ;;  %v4350_v35 = vld [vmem:[%s6451_s5 + $0x18] sm:$0xff] }
 0x164   :  { %2548 = vmatpush.bf16.msrb.mxu0 %v4351_v30 }
 0x168   :  { %v1800_v47 = vpop.f32.mrf.mxu2  ;;  %v1774_v8 = vpop.f32.mrf.mxu0  ;;  %2549 = vmatpush.bf16.msrb.mxu0 %v4350_v35  ;;  %v4364_v35 = vld [vmem:[%s6452_s7 + $0x8] sm:$0xff] }
 0x169   :  { %v1801_v50 = vadd.f32 %v1800_v47, %v1787_v45  ;;  %v1814_v51 = vpop.f32.mrf.mxu3  ;;  %v1775_v56 = vadd.f32 %v1774_v8, %v1761_v49  ;;  %v1788_v3 = vpop.f32.mrf.mxu1  ;;  %v4356_v45 = vld [vmem:[%s6451_s5 + $0x48] sm:$0xff]  ;;  %v4355_v47 = vld [vmem:[%s6451_s5 + $0x40] sm:$0xff] }
 0x16a   :  { %2565 = vmatpush.bf16.msrb.mxu1 %v4356_v45 }
 0x16b   :  { %v1815_v2 = vadd.f32 %v1814_v51, %v1801_v50  ;;  %v1789_v23 = vadd.f32 %v1788_v3, %v1775_v56  ;;  %v4369_v51 = vld [vmem:[%s6452_s7 + $0x30] sm:$0xff] }
 0x16c   :  { %2550 = vmatpush.bf16.msrb.mxu0 %v4349_v38  ;;  %v2575_v38 = vld [vmem:[%s6453_s6] sm:$0x1] }
 0x16d   :  { %v1820_v60 = vpack.c.bf16 %v1815_v2, %v1717_v58  ;;  %v2387_v2 = vld [vmem:[#allocation1] sm:$0xff] }
 0x16e   :  { %2566 = vmatpush.bf16.msrb.mxu1 %v4355_v47  ;;  %v2389_v3 = vpack.i.b16 %v2387_v2, %v2387_v2  ;;  %v4374_v2 = vld [vmem:[%s6454_s9 + $0x18] sm:$0xff] }
 0x16f   :  { %v1844_v42 = vunpack.c.l.bf16 %v1820_v60  ;;  %v1845_v43 = vunpack.c.h.bf16 %v1820_v60  ;;  %v2392_v60 = vpack.i.b16 %v2388_v20, %v2388_v20  ;;  %v4373_v20 = vld [vmem:[%s6454_s9 + $0x10] sm:$0xff] }
 0x170   :  { %v1802_v27 = vpop.f32.mrf.mxu2  ;;  %2551 = vmatpush.bf16.msrb.mxu0 %v4348_v44  ;;  %v2577_v44 = vpack.i.b16 %v2575_v38, %v2575_v38 }
 0x171   :  { %v1803_v9 = vadd.f32 %v1802_v27, %v1789_v23  ;;  %v1816_v46 = vpop.f32.mrf.mxu3  ;;  %v1856_v10 = vadd.f32 %v1852_v37, %v1844_v42  ;;  %v1857_v41 = vadd.f32 %v1853_v24, %v1845_v43 }
 0x173   :  { %v1817_v0 = vadd.f32 %v1816_v46, %v1803_v9  ;;  %v1876_v17 = vmax.f32 %v1856_v10, 0.0  ;;  %v1877_v59 = vmax.f32 %v1857_v41, 0.0 }
 0x174   :  { %2552 = vmatpush.bf16.msrb.mxu0 %v4347_v57 }
 0x175   :  { %v1822_v29 = vpack.c.bf16 %v1817_v0, %v1719_v22  ;;  %v2391_v22 = vperm.slane %v2389_v3, 0 }
 0x177   :  { %v1848_v12 = vunpack.c.l.bf16 %v1822_v29  ;;  %v1849_v15 = vunpack.c.h.bf16 %v1822_v29  ;;  %v2399_v29 = vunpack.c.l.bf16 %v2391_v22 }
 0x179   :  { %v1860_v40 = vadd.f32 %v1852_v37, %v1848_v12  ;;  %v1861_v11 = vadd.f32 %v1853_v24, %v1849_v15  ;;  %v2394_v37 = vperm.slane %v2392_v60, 0 }
 0x17b   :  { %v1880_v28 = vmax.f32 %v1860_v40, 0.0  ;;  %v1881_v18 = vmax.f32 %v1861_v11, 0.0  ;;  %v2400_v10 = vunpack.c.l.bf16 %v2394_v37 }
 0x17d   :  { %v1884_v19 = vpack.c.bf16 %v1880_v28, %v1876_v17  ;;  %v1885_v21 = vpack.c.bf16 %v1881_v18, %v1877_v59 }
 0x17f   :  { %2306 = vmatmul.bf16.vlgmr.msrb.gmra.mxu2 %v1884_v19  ;;  %2320 = vmatmul.bf16.vlgmr.msrb.gmra.mxu3 %v1885_v21 }
 0x180   :  { %2656 = vmatpush.bf16.msrb.mxu2 %v4370_v48  ;;  %2729 = vmatpush.bf16.msrb.mxu3 %v4374_v2 }
 0x184   :  { %2657 = vmatpush.bf16.msrb.mxu2 %v4369_v51  ;;  %2730 = vmatpush.bf16.msrb.mxu3 %v4373_v20 }
 0x188   :  { %2658 = vmatpush.bf16.msrb.mxu2 %v4368_v7 }
 0x18c   :  { %2659 = vmatpush.bf16.msrb.mxu2 %v4367_v31 }
 0x18f   :  { %2362 = vmatmul.bf16.vlgmr.msra.gmra.mxu2 %v1884_v19  ;;  %2376 = vmatmul.bf16.vlgmr.msra.gmra.mxu3 %v1885_v21 }
 0x194   :  { %v2279_v33 = vpop.f32.mrf.mxu0  ;;  %v2293_v34 = vpop.f32.mrf.mxu1 }
 0x195   :  { %v2294_v53 = vadd.f32 %v2293_v34, %v2279_v33  ;;  %v4366_v33 = vld [vmem:[%s6452_s7 + $0x18] sm:$0xff]  ;;  %v4365_v34 = vld [vmem:[%s6452_s7 + $0x10] sm:$0xff] }
 0x196   :  { %2660 = vmatpush.bf16.msrb.mxu2 %v4366_v33 }
 0x19a   :  { %2661 = vmatpush.bf16.msrb.mxu2 %v4365_v34 }
 0x19c   :  { %v2281_v55 = vpop.f32.mrf.mxu0  ;;  %v2295_v61 = vpop.f32.mrf.mxu1 }
 0x19d   :  { %v2296_v27 = vadd.f32 %v2295_v61, %v2281_v55 }
 0x19e   :  { %2662 = vmatpush.bf16.msrb.mxu2 %v4364_v35 }
 0x1a2   :  { %2663 = vmatpush.bf16.msrb.mxu2 %v4363_v36 }
 0x1a4   :  { %v2335_v8 = vpop.f32.mrf.mxu0  ;;  %v2349_v52 = vpop.f32.mrf.mxu1 }
 0x1a5   :  { %v2350_v62 = vadd.f32 %v2349_v52, %v2335_v8 }
 0x1ac   :  { %v2337_v23 = vpop.f32.mrf.mxu0  ;;  %v2351_v6 = vpop.f32.mrf.mxu1 }
 0x1ad   :  { %v2352_v46 = vadd.f32 %v2351_v6, %v2337_v23 }
 0x202   :  { %v2307_v5 = vpop.f32.mrf.mxu2  ;;  %v2321_v13 = vpop.f32.mrf.mxu3 }
 0x203   :  { %v2308_v58 = vadd.f32 %v2307_v5, %v2294_v53  ;;  %v2579_v5 = vperm.slane %v2577_v44, 0 }
 0x205   :  { %v2322_v9 = vadd.f32 %v2321_v13, %v2308_v58  ;;  %v2582_v48 = vunpack.c.l.bf16 %v2579_v5  ;;  %v2672_v58 = vld [vmem:[%s6455_s8] sm:$0x1] }
 0x20a   :  { %v2309_v49 = vpop.f32.mrf.mxu2  ;;  %v2323_v50 = vpop.f32.mrf.mxu3 }
 0x20b   :  { %v2310_v42 = vadd.f32 %v2309_v49, %v2296_v27 }
 0x20d   :  { %v2324_v12 = vadd.f32 %v2323_v50, %v2310_v42 }
 0x212   :  { %v2363_v56 = vpop.f32.mrf.mxu2  ;;  %v2377_v16 = vpop.f32.mrf.mxu3 }
 0x213   :  { %v2364_v1 = vadd.f32 %v2363_v56, %v2350_v62  ;;  %v4372_v56 = vld [vmem:[%s6454_s9 + $0x8] sm:$0xff] }
 0x214   :  { %2731 = vmatpush.bf16.msrb.mxu3 %v4372_v56 }
 0x215   :  { %v2378_v4 = vadd.f32 %v2377_v16, %v2364_v1  ;;  %v4371_v16 = vld [vmem:[%s6454_s9] sm:$0xff]  ;;  %v2674_v1 = vpack.i.b16 %v2672_v58, %v2672_v58 }
 0x217   :  { %v2382_v43 = vpack.c.bf16 %v2378_v4, %v2322_v9  ;;  %v2676_v4 = vperm.slane %v2674_v1, 0 }
 0x218   :  { %2732 = vmatpush.bf16.msrb.mxu3 %v4371_v16 }
 0x219   :  { %v2395_v15 = vunpack.c.l.bf16 %v2382_v43  ;;  %v2396_v40 = vunpack.c.h.bf16 %v2382_v43  ;;  %v2679_v6 = vunpack.c.l.bf16 %v2676_v4 }
 0x21a   :  { %v2365_v24 = vpop.f32.mrf.mxu2  ;;  %v2379_v41 = vpop.f32.mrf.mxu3 }
 0x21b   :  { %v2366_v0 = vadd.f32 %v2365_v24, %v2352_v46  ;;  %v2401_v59 = vadd.f32 %v2399_v29, %v2395_v15  ;;  %v2402_v28 = vadd.f32 %v2400_v10, %v2396_v40 }
 0x21d   :  { %v2380_v11 = vadd.f32 %v2379_v41, %v2366_v0  ;;  %v2411_v32 = vmax.f32 %v2401_v59, 0.0  ;;  %v2412_v39 = vmax.f32 %v2402_v28, 0.0  ;;  %v2741_v0 = vld [vmem:[%s6456_s10] sm:$0x1] }
 0x21f   :  { %v2383_v17 = vpack.c.bf16 %v2380_v11, %v2324_v12 }
 0x221   :  { %v2397_v18 = vunpack.c.l.bf16 %v2383_v17  ;;  %v2398_v19 = vunpack.c.h.bf16 %v2383_v17 }
 0x223   :  { %v2403_v21 = vadd.f32 %v2399_v29, %v2397_v18  ;;  %v2404_v54 = vadd.f32 %v2400_v10, %v2398_v19  ;;  %v2743_v10 = vpack.i.b16 %v2741_v0, %v2741_v0 }
 0x225   :  { %v2413_v25 = vmax.f32 %v2403_v21, 0.0  ;;  %v2414_v63 = vmax.f32 %v2404_v54, 0.0  ;;  %v2745_v12 = vperm.slane %v2743_v10, 0 }
 0x227   :  { %v2415_v26 = vpack.c.bf16 %v2413_v25, %v2411_v32  ;;  %v2416_v30 = vpack.c.bf16 %v2414_v63, %v2412_v39  ;;  %v2748_v11 = vunpack.c.l.bf16 %v2745_v12 }
 0x229   :  { %2553 = vmatmul.bf16.vlgmr.msrb.gmra.mxu0 %v2415_v26  ;;  %2567 = vmatmul.bf16.vlgmr.msrb.gmra.mxu1 %v2416_v30 }
 0x2a6   :  { %v2554_v14 = vpop.f32.mrf.mxu0  ;;  %v2568_v55 = vpop.f32.mrf.mxu1 }
 0x2a7   :  { %v2569_v61 = vadd.f32 %v2568_v55, %v2554_v14 }
 0x2a9   :  { %v2573_v45 = vpack.c.bf16 %v2569_v61, %v2569_v61 }
 0x2ab   :  { %v2580_v47 = vunpack.c.l.bf16 %v2573_v45 }
 0x2ad   :  { %v2583_v51 = vadd.f32 %v2582_v48, %v2580_v47 }
 0x2ae   :  { %v2556_v13 = vpop.f32.mrf.mxu0  ;;  %v2570_v57 = vpop.f32.mrf.mxu1 }
 0x2af   :  { %v2571_v49 = vadd.f32 %v2570_v57, %v2556_v13  ;;  %v2589_v7 = vmax.f32 %v2583_v51, 0.0 }
 0x2b1   :  { %v2574_v50 = vpack.c.bf16 %v2571_v49, %v2571_v49 }
 0x2b3   :  { %v2581_v8 = vunpack.c.l.bf16 %v2574_v50 }
 0x2b5   :  { %v2584_v52 = vadd.f32 %v2582_v48, %v2581_v8 }
 0x2b7   :  { %v2590_v53 = vmax.f32 %v2584_v52, 0.0 }
 0x2b9   :  { %v2591_v62 = vpack.c.bf16 %v2590_v53, %v2589_v7 }
 0x2bb   :  { %2664 = vmatmul.bf16.vlgmr.msrb.gmra.mxu2 %v2591_v62 }
 0x33e   :  { %v2665_v3 = vpop.f32.mrf.mxu2 }
 0x33f   :  { %v2670_v60 = vpack.c.bf16 %v2665_v3, %v2665_v3 }
 0x341   :  { %v2677_v23 = vunpack.c.l.bf16 %v2670_v60 }
 0x343   :  { %v2680_v22 = vadd.f32 %v2679_v6, %v2677_v23 }
 0x345   :  { %v2686_v42 = vmax.f32 %v2680_v22, 0.0 }
 0x346   :  { %v2667_v27 = vpop.f32.mrf.mxu2 }
 0x347   :  { %v2671_v9 = vpack.c.bf16 %v2667_v27, %v2667_v27 }
 0x349   :  { %v2678_v37 = vunpack.c.l.bf16 %v2671_v9 }
 0x34b   :  { %v2681_v46 = vadd.f32 %v2679_v6, %v2678_v37 }
 0x34d   :  { %v2687_v43 = vmax.f32 %v2681_v46, 0.0 }
 0x34f   :  { %v2688_v24 = vpack.c.bf16 %v2687_v43, %v2686_v42 }
 0x351   :  { %4051 = vmatmul.msk.bf16.vlgmr.msrb.gmra.mxu3 %vm2721_vm0, %v2688_v24 }
 0x3d4   :  { %v2734_v29 = vpop.f32.mrf.mxu3 }
 0x3d5   :  { %v2739_v41 = vpack.c.bf16 %v2734_v29, %v2734_v29 }
 0x3d7   :  { %v2746_v40 = vunpack.c.l.bf16 %v2739_v41 }
 0x3d9   :  { %v2749_v28 = vadd.f32 %v2748_v11, %v2746_v40 }
 0x3dc   :  { %v2736_v15 = vpop.f32.mrf.mxu3 }
 0x3dd   :  { %v2740_v17 = vpack.c.bf16 %v2736_v15, %v2736_v15 }
 0x3df   :  { %v2747_v59 = vunpack.c.l.bf16 %v2740_v17 }
 0x3e1   :  { %v2750_v18 = vadd.f32 %v2748_v11, %v2747_v59 }
 0x3e3   :  { %v4378_v19 = vpack.c.bf16 %v2750_v18, %v2749_v28 }
 0x3e5   :  { %4379 = vst [vmem:[%s6457_s11] sm:$0xff] %v4378_v19  }

</bundles_post_ra>
